<compile_context>
chip_gen: v5e
topology: v5e:2x2
jax: 0.10.0
libtpu: 0.0.40
codegen_flags: <defaults>
</compile_context>

<pallas_src>
import jax
import jax.numpy as jnp
from jax.experimental import pallas as pl
from jax.experimental.pallas import tpu as pltpu

MATMUL_DTYPE = jnp.float32          # jnp.bfloat16 for ~2x MXU path (looser tol)
TILE_M = 512                        # lane-axis tile for conv matmuls (mult of 128)
TILE_B = 512                        # row tile for the final linear (mult of 8)
VMEM_LIMIT_BYTES = 32 * 1024 * 1024  # safe for v5e/v6e/v7x scoped budgets

N_INPUT_CHANNELS = 3
FEATURES_DIM = 64
N_FLATTEN = 64 * 2 * 2              # 128 -> 31 -> 14 -> 6 -> 2 spatial; 64*2*2


def _round_up(x, m):
    return (x + m - 1) // m * m


# ----------------------------- Pallas kernels ------------------------------

def _conv_matmul_kernel(w_ref, b_ref, p_ref, o_ref):
    # out[Cout, TILE_M] = relu(W[Cout, K] @ patches[K, TILE_M] + b[Cout, 1])
    acc = jnp.dot(w_ref[...], p_ref[...], preferred_element_type=jnp.float32)
    o_ref[...] = jnp.maximum(acc + b_ref[...], 0.0)


def conv_matmul_bias_relu(w_mat, b_col, patches):
    """Lane-dense conv-as-matmul: relu([Cout,K] @ [K,M] + b) -> [Cout, M]."""
    Cout, K = w_mat.shape
    M = patches.shape[1]
    tm = min(TILE_M, _round_up(M, 128))
    Mp = _round_up(M, tm)
    if Mp != M:
        patches = jnp.pad(patches, ((0, 0), (0, Mp - M)))
    out = pl.pallas_call(
        _conv_matmul_kernel,
        out_shape=jax.ShapeDtypeStruct((Cout, Mp), jnp.float32),
        grid=(Mp // tm,),
        in_specs=[
            pl.BlockSpec((Cout, K), lambda i: (0, 0)),   # weights: resident
            pl.BlockSpec((Cout, 1), lambda i: (0, 0)),   # bias: resident
            pl.BlockSpec((K, tm), lambda i: (0, i)),     # patch tile: pipelined
        ],
        out_specs=pl.BlockSpec((Cout, tm), lambda i: (0, i)),
        compiler_params=pltpu.CompilerParams(
            dimension_semantics=("parallel",),
            vmem_limit_bytes=VMEM_LIMIT_BYTES,
        ),
    )(w_mat.astype(MATMUL_DTYPE), b_col, patches.astype(MATMUL_DTYPE))
    return out[:, :M] if Mp != M else out


def _linear_l2norm_kernel(x_ref, w_ref, b_ref, o_ref):
    y = jnp.dot(x_ref[...], w_ref[...], preferred_element_type=jnp.float32)
    y = y + b_ref[...]
    sumsq = jnp.sum(y * y, axis=1, keepdims=True)
    # F.normalize: x / max(||x||_2, eps), eps=1e-12  ==  x * rsqrt(max(ss, eps^2))
    o_ref[...] = y * jax.lax.rsqrt(jnp.maximum(sumsq, 1e-24))


def linear_l2norm(x, w_t, b_row):
    """L2-normalize(x @ w_t + b, dim=1); x:[B,K] w_t:[K,N] b_row:[1,N] -> [B,N]."""
    B, K = x.shape
    N = w_t.shape[1]
    tb = min(TILE_B, _round_up(B, 8))
    Bp = _round_up(B, tb)
    if Bp != B:
        x = jnp.pad(x, ((0, Bp - B), (0, 0)))
    out = pl.pallas_call(
        _linear_l2norm_kernel,
        out_shape=jax.ShapeDtypeStruct((Bp, N), jnp.float32),
        grid=(Bp // tb,),
        in_specs=[
            pl.BlockSpec((tb, K), lambda i: (i, 0)),
            pl.BlockSpec((K, N), lambda i: (0, 0)),
            pl.BlockSpec((1, N), lambda i: (0, 0)),
        ],
        out_specs=pl.BlockSpec((tb, N), lambda i: (i, 0)),
        compiler_params=pltpu.CompilerParams(
            dimension_semantics=("parallel",),
            vmem_limit_bytes=VMEM_LIMIT_BYTES,
        ),
    )(x.astype(MATMUL_DTYPE), w_t.astype(MATMUL_DTYPE), b_row)
    return out[:B] if Bp != B else out


# ------------------------------ conv plumbing ------------------------------

def _im2col_cf(x_cf, kh, kw, stride, pad):
    """x_cf: [C, B, H, W] (channel-first). Returns ([kh*kw*C, B*Ho*Wo], (B,Ho,Wo)).

    K ordering is (kh, kw, Cin), matching weights prepared as
    transpose(w_oihw, (0, 2, 3, 1)).reshape(Cout, kh*kw*Cin).
    """
    C, B, H, W = x_cf.shape
    if pad:
        x_cf = jnp.pad(x_cf, ((0, 0), (0, 0), (pad, pad), (pad, pad)))
    Hp, Wp = H + 2 * pad, W + 2 * pad
    Ho = (Hp - kh) // stride + 1
    Wo = (Wp - kw) // stride + 1
    cols = []
    for i in range(kh):
        for j in range(kw):
            cols.append(x_cf[:, :, i:i + stride * Ho:stride,
                             j:j + stride * Wo:stride])      # [C, B, Ho, Wo]
    patches = jnp.stack(cols, axis=0)                         # [kh*kw, C, B, Ho, Wo]
    return patches.reshape(kh * kw * C, B * Ho * Wo), (B, Ho, Wo)


def conv_relu(x_cf, w_mat, b_col, kh, kw, stride, pad):
    """Conv2d + bias + ReLU on channel-first activations; returns [Cout, B, Ho, Wo]."""
    patches, (B, Ho, Wo) = _im2col_cf(x_cf, kh, kw, stride, pad)
    y = conv_matmul_bias_relu(w_mat, b_col, patches)          # [Cout, B*Ho*Wo]
    return y.reshape(w_mat.shape[0], B, Ho, Wo)


# --------------------------------- FE model --------------------------------

def init_params(key):
    def uinit(k, shape, fan_in):
        bound = 1.0 / jnp.sqrt(fan_in)
        return jax.random.uniform(k, shape, jnp.float32, -bound, bound)

    ks = jax.random.split(key, 10)
    p = {}
    p["w1"] = uinit(ks[0], (16, 3, 8, 8), 3 * 8 * 8)
    p["b1"] = uinit(ks[1], (16,), 3 * 8 * 8)
    p["w2"] = uinit(ks[2], (32, 16, 4, 4), 16 * 4 * 4)
    p["b2"] = uinit(ks[3], (32,), 16 * 4 * 4)
    p["w3"] = uinit(ks[4], (64, 32, 3, 3), 32 * 3 * 3)
    p["b3"] = uinit(ks[5], (64,), 32 * 3 * 3)
    p["w4"] = uinit(ks[6], (64, 64, 3, 3), 64 * 3 * 3)
    p["b4"] = uinit(ks[7], (64,), 64 * 3 * 3)
    p["wl"] = uinit(ks[8], (FEATURES_DIM, N_FLATTEN), N_FLATTEN)
    p["bl"] = uinit(ks[9], (FEATURES_DIM,), N_FLATTEN)
    return p


def prepare_params(p):
    """One-time weight prep, hoisted out of the forward path."""
    def conv_w(w):  # OIHW -> [Cout, kh*kw*Cin], ordering (kh, kw, Cin)
        return jnp.transpose(w, (0, 2, 3, 1)).reshape(w.shape[0], -1)

    return {
        "w1m": conv_w(p["w1"]), "b1c": p["b1"].reshape(-1, 1),
        "w2m": conv_w(p["w2"]), "b2c": p["b2"].reshape(-1, 1),
        "w3m": conv_w(p["w3"]), "b3c": p["b3"].reshape(-1, 1),
        "w4m": conv_w(p["w4"]), "b4c": p["b4"].reshape(-1, 1),
        "wlT": p["wl"].T,       "blr": p["bl"].reshape(1, -1),
    }


def fe_forward(observations, prep):
    B = observations.shape[0]
    x = observations.reshape(B, N_INPUT_CHANNELS, 128, 128).astype(jnp.float32)
    # NOTE: dropout_rate=None and augmentation_rate=None (module defaults) ->
    # no Dropout and no augmentation layer in the forward pass.
    x = jnp.transpose(x, (1, 0, 2, 3))                        # [C, B, H, W]
    x = conv_relu(x, prep["w1m"], prep["b1c"], 8, 8, 4, 1)    # [16, B, 31, 31]
    x = conv_relu(x, prep["w2m"], prep["b2c"], 4, 4, 2, 0)    # [32, B, 14, 14]
    x = conv_relu(x, prep["w3m"], prep["b3c"], 3, 3, 2, 0)    # [64, B,  6,  6]
    x = conv_relu(x, prep["w4m"], prep["b4c"], 3, 3, 2, 0)    # [64, B,  2,  2]
    # nn.Flatten on NCHW: per-batch (C, H, W) ordering.
    x = jnp.transpose(x, (1, 0, 2, 3)).reshape(B, N_FLATTEN)
    return linear_l2norm(x, prep["wlT"], prep["blr"])         # [B, 64], L2-normalized


# ------------------------------ reference check ----------------------------

def fe_reference(observations, params):
    B = observations.shape[0]
    x = observations.reshape(B, N_INPUT_CHANNELS, 128, 128).astype(jnp.float32)

    def conv(x, w, b, s, p):
        y = jax.lax.conv_general_dilated(
            x, w, (s, s), ((p, p), (p, p)),
            dimension_numbers=("NCHW", "OIHW", "NCHW"))
        return jnp.maximum(y + b[None, :, None, None], 0.0)

    x = conv(x, params["w1"], params["b1"], 4, 1)
    x = conv(x, params["w2"], params["b2"], 2, 0)
    x = conv(x, params["w3"], params["b3"], 2, 0)
    x = conv(x, params["w4"], params["b4"], 2, 0)
    x = x.reshape(B, -1)
    y = x @ params["wl"].T + params["bl"]
    n = jnp.sqrt(jnp.sum(y * y, axis=1, keepdims=True))
    return y / jnp.maximum(n, 1e-12)


if __name__ == "__main__":
    key = jax.random.PRNGKey(0)
    pkey, xkey = jax.random.split(key)
    params = init_params(pkey)
    prep = prepare_params(params)
    observations = jax.random.normal(xkey, (2, 3, 128, 128), dtype=jnp.float32)

    fwd = jax.jit(fe_forward)
    out = jax.block_until_ready(fwd(observations, prep))
    ref = jax.block_until_ready(fe_reference(observations, params))

    assert out.shape == (2, FEATURES_DIM), out.shape
    max_err = float(jnp.max(jnp.abs(out - ref)))
    assert jnp.allclose(out, ref, atol=1e-4, rtol=1e-4), max_err
    print("KERNEL_OK")
</pallas_src>

<mosaic_0001>
module attributes {stable_mosaic.version = 11 : i64} {
  func.func @_conv_matmul_kernel(%arg0: i32, %arg1: memref<16x192xf32, #tpu.memory_space<vmem>>, %arg2: memref<16x1xf32, #tpu.memory_space<vmem>>, %arg3: memref<192x512xf32, #tpu.memory_space<vmem>>, %arg4: memref<16x512xf32, #tpu.memory_space<vmem>>) attributes {dimension_semantics = [#tpu.dimension_semantics<parallel>], iteration_bounds = array<i64: 4>, scalar_prefetch = 0 : i64, scratch_operands = 0 : i64, tpu.core_type = #tpu.core_type<tc>, window_params = [{pipeline_mode = #tpu.pipeline_mode<synchronous>, transform_indices = @transform_0, window_bounds = array<i64: 16, 192>}, {pipeline_mode = #tpu.pipeline_mode<synchronous>, transform_indices = @transform_1, window_bounds = array<i64: 16, 1>}, {transform_indices = @transform_2, window_bounds = array<i64: 192, 512>}, {transform_indices = @transform_3, window_bounds = array<i64: 16, 512>}]} {
    %c0 = arith.constant 0 : index
    %c0_0 = arith.constant 0 : index
    %0 = vector.load %arg1[%c0, %c0_0] : memref<16x192xf32, #tpu.memory_space<vmem>>, vector<16x192xf32>
    %c0_1 = arith.constant 0 : index
    %c0_2 = arith.constant 0 : index
    %1 = vector.load %arg3[%c0_1, %c0_2] : memref<192x512xf32, #tpu.memory_space<vmem>>, vector<192x512xf32>
    %cst = arith.constant dense<0.000000e+00> : vector<16x512xf32>
    %2 = tpu.matmul %0, %1, %cst {dimension_numbers = #tpu.dot_dimension_numbers<[1], [0], [0], [1], [0, 0, 1, 1], [], []>} : vector<16x192xf32>, vector<192x512xf32>, vector<16x512xf32> -> vector<16x512xf32>
    %c0_3 = arith.constant 0 : index
    %c0_4 = arith.constant 0 : index
    %3 = vector.load %arg2[%c0_3, %c0_4] : memref<16x1xf32, #tpu.memory_space<vmem>>, vector<16x1xf32>
    %4 = vector.broadcast %3 : vector<16x1xf32> to vector<16x512xf32>
    %5 = arith.addf %2, %4 : vector<16x512xf32>
    %cst_5 = arith.constant 0.000000e+00 : f32
    %6 = vector.broadcast %cst_5 : f32 to vector<16x512xf32>
    %7 = arith.maximumf %5, %6 : vector<16x512xf32>
    %c0_6 = arith.constant 0 : index
    %c0_7 = arith.constant 0 : index
    %8 = vector.load %arg4[%c0_6, %c0_7] : memref<16x512xf32, #tpu.memory_space<vmem>>, vector<16x512xf32>
    tpu.vector_store %arg4[%c0_6, %c0_7], %7 {strides = array<i32>} : memref<16x512xf32, #tpu.memory_space<vmem>>, vector<16x512xf32>,
    return
  }
  func.func @transform_0(%arg0: i32) -> (i32, i32) {
    %c0_i32 = arith.constant 0 : i32
    %c0_i32_0 = arith.constant 0 : i32
    %c0_i32_1 = arith.constant 0 : i32
    return %c0_i32, %c0_i32_0 : i32, i32
  }
  func.func @transform_1(%arg0: i32) -> (i32, i32) {
    %c0_i32 = arith.constant 0 : i32
    %c0_i32_0 = arith.constant 0 : i32
    %c0_i32_1 = arith.constant 0 : i32
    return %c0_i32, %c0_i32_0 : i32, i32
  }
  func.func @transform_2(%arg0: i32) -> (i32, i32) {
    %c0_i32 = arith.constant 0 : i32
    %c0_i32_0 = arith.constant 0 : i32
    return %c0_i32, %arg0 : i32, i32
  }
  func.func @transform_3(%arg0: i32) -> (i32, i32) {
    %c0_i32 = arith.constant 0 : i32
    %c0_i32_0 = arith.constant 0 : i32
    return %c0_i32, %arg0 : i32, i32
  }
}

module attributes {stable_mosaic.version = 11 : i64} {
  func.func @_conv_matmul_kernel(%arg0: i32, %arg1: memref<32x256xf32, #tpu.memory_space<vmem>>, %arg2: memref<32x1xf32, #tpu.memory_space<vmem>>, %arg3: memref<256x512xf32, #tpu.memory_space<vmem>>, %arg4: memref<32x512xf32, #tpu.memory_space<vmem>>) attributes {dimension_semantics = [#tpu.dimension_semantics<parallel>], iteration_bounds = array<i64: 1>, scalar_prefetch = 0 : i64, scratch_operands = 0 : i64, tpu.core_type = #tpu.core_type<tc>, window_params = [{pipeline_mode = #tpu.pipeline_mode<synchronous>, transform_indices = @transform_0, window_bounds = array<i64: 32, 256>}, {pipeline_mode = #tpu.pipeline_mode<synchronous>, transform_indices = @transform_1, window_bounds = array<i64: 32, 1>}, {transform_indices = @transform_2, window_bounds = array<i64: 256, 512>}, {transform_indices = @transform_3, window_bounds = array<i64: 32, 512>}]} {
    %c0 = arith.constant 0 : index
    %c0_0 = arith.constant 0 : index
    %0 = vector.load %arg1[%c0, %c0_0] : memref<32x256xf32, #tpu.memory_space<vmem>>, vector<32x256xf32>
    %c0_1 = arith.constant 0 : index
    %c0_2 = arith.constant 0 : index
    %1 = vector.load %arg3[%c0_1, %c0_2] : memref<256x512xf32, #tpu.memory_space<vmem>>, vector<256x512xf32>
    %cst = arith.constant dense<0.000000e+00> : vector<32x512xf32>
    %2 = tpu.matmul %0, %1, %cst {dimension_numbers = #tpu.dot_dimension_numbers<[1], [0], [0], [1], [0, 0, 1, 1], [], []>} : vector<32x256xf32>, vector<256x512xf32>, vector<32x512xf32> -> vector<32x512xf32>
    %c0_3 = arith.constant 0 : index
    %c0_4 = arith.constant 0 : index
    %3 = vector.load %arg2[%c0_3, %c0_4] : memref<32x1xf32, #tpu.memory_space<vmem>>, vector<32x1xf32>
    %4 = vector.broadcast %3 : vector<32x1xf32> to vector<32x512xf32>
    %5 = arith.addf %2, %4 : vector<32x512xf32>
    %cst_5 = arith.constant 0.000000e+00 : f32
    %6 = vector.broadcast %cst_5 : f32 to vector<32x512xf32>
    %7 = arith.maximumf %5, %6 : vector<32x512xf32>
    %c0_6 = arith.constant 0 : index
    %c0_7 = arith.constant 0 : index
    %8 = vector.load %arg4[%c0_6, %c0_7] : memref<32x512xf32, #tpu.memory_space<vmem>>, vector<32x512xf32>
    tpu.vector_store %arg4[%c0_6, %c0_7], %7 {strides = array<i32>} : memref<32x512xf32, #tpu.memory_space<vmem>>, vector<32x512xf32>,
    return
  }
  func.func @transform_0(%arg0: i32) -> (i32, i32) {
    %c0_i32 = arith.constant 0 : i32
    %c0_i32_0 = arith.constant 0 : i32
    %c0_i32_1 = arith.constant 0 : i32
    return %c0_i32, %c0_i32_0 : i32, i32
  }
  func.func @transform_1(%arg0: i32) -> (i32, i32) {
    %c0_i32 = arith.constant 0 : i32
    %c0_i32_0 = arith.constant 0 : i32
    %c0_i32_1 = arith.constant 0 : i32
    return %c0_i32, %c0_i32_0 : i32, i32
  }
  func.func @transform_2(%arg0: i32) -> (i32, i32) {
    %c0_i32 = arith.constant 0 : i32
    %c0_i32_0 = arith.constant 0 : i32
    return %c0_i32, %arg0 : i32, i32
  }
  func.func @transform_3(%arg0: i32) -> (i32, i32) {
    %c0_i32 = arith.constant 0 : i32
    %c0_i32_0 = arith.constant 0 : i32
    return %c0_i32, %arg0 : i32, i32
  }
}

module attributes {stable_mosaic.version = 11 : i64} {
  func.func @_conv_matmul_kernel(%arg0: i32, %arg1: memref<64x288xf32, #tpu.memory_space<vmem>>, %arg2: memref<64x1xf32, #tpu.memory_space<vmem>>, %arg3: memref<288x128xf32, #tpu.memory_space<vmem>>, %arg4: memref<64x128xf32, #tpu.memory_space<vmem>>) attributes {dimension_semantics = [#tpu.dimension_semantics<parallel>], iteration_bounds = array<i64: 1>, scalar_prefetch = 0 : i64, scratch_operands = 0 : i64, tpu.core_type = #tpu.core_type<tc>, window_params = [{pipeline_mode = #tpu.pipeline_mode<synchronous>, transform_indices = @transform_0, window_bounds = array<i64: 64, 288>}, {pipeline_mode = #tpu.pipeline_mode<synchronous>, transform_indices = @transform_1, window_bounds = array<i64: 64, 1>}, {transform_indices = @transform_2, window_bounds = array<i64: 288, 128>}, {transform_indices = @transform_3, window_bounds = array<i64: 64, 128>}]} {
    %c0 = arith.constant 0 : index
    %c0_0 = arith.constant 0 : index
    %0 = vector.load %arg1[%c0, %c0_0] : memref<64x288xf32, #tpu.memory_space<vmem>>, vector<64x288xf32>
    %c0_1 = arith.constant 0 : index
    %c0_2 = arith.constant 0 : index
    %1 = vector.load %arg3[%c0_1, %c0_2] : memref<288x128xf32, #tpu.memory_space<vmem>>, vector<288x128xf32>
    %cst = arith.constant dense<0.000000e+00> : vector<64x128xf32>
    %2 = tpu.matmul %0, %1, %cst {dimension_numbers = #tpu.dot_dimension_numbers<[1], [0], [0], [1], [0, 0, 1, 1], [], []>} : vector<64x288xf32>, vector<288x128xf32>, vector<64x128xf32> -> vector<64x128xf32>
    %c0_3 = arith.constant 0 : index
    %c0_4 = arith.constant 0 : index
    %3 = vector.load %arg2[%c0_3, %c0_4] : memref<64x1xf32, #tpu.memory_space<vmem>>, vector<64x1xf32>
    %4 = vector.broadcast %3 : vector<64x1xf32> to vector<64x128xf32>
    %5 = arith.addf %2, %4 : vector<64x128xf32>
    %cst_5 = arith.constant 0.000000e+00 : f32
    %6 = vector.broadcast %cst_5 : f32 to vector<64x128xf32>
    %7 = arith.maximumf %5, %6 : vector<64x128xf32>
    %c0_6 = arith.constant 0 : index
    %c0_7 = arith.constant 0 : index
    %8 = vector.load %arg4[%c0_6, %c0_7] : memref<64x128xf32, #tpu.memory_space<vmem>>, vector<64x128xf32>
    tpu.vector_store %arg4[%c0_6, %c0_7], %7 {strides = array<i32>} : memref<64x128xf32, #tpu.memory_space<vmem>>, vector<64x128xf32>,
    return
  }
  func.func @transform_0(%arg0: i32) -> (i32, i32) {
    %c0_i32 = arith.constant 0 : i32
    %c0_i32_0 = arith.constant 0 : i32
    %c0_i32_1 = arith.constant 0 : i32
    return %c0_i32, %c0_i32_0 : i32, i32
  }
  func.func @transform_1(%arg0: i32) -> (i32, i32) {
    %c0_i32 = arith.constant 0 : i32
    %c0_i32_0 = arith.constant 0 : i32
    %c0_i32_1 = arith.constant 0 : i32
    return %c0_i32, %c0_i32_0 : i32, i32
  }
  func.func @transform_2(%arg0: i32) -> (i32, i32) {
    %c0_i32 = arith.constant 0 : i32
    %c0_i32_0 = arith.constant 0 : i32
    return %c0_i32, %arg0 : i32, i32
  }
  func.func @transform_3(%arg0: i32) -> (i32, i32) {
    %c0_i32 = arith.constant 0 : i32
    %c0_i32_0 = arith.constant 0 : i32
    return %c0_i32, %arg0 : i32, i32
  }
}

module attributes {stable_mosaic.version = 11 : i64} {
  func.func @_conv_matmul_kernel(%arg0: i32, %arg1: memref<64x576xf32, #tpu.memory_space<vmem>>, %arg2: memref<64x1xf32, #tpu.memory_space<vmem>>, %arg3: memref<576x128xf32, #tpu.memory_space<vmem>>, %arg4: memref<64x128xf32, #tpu.memory_space<vmem>>) attributes {dimension_semantics = [#tpu.dimension_semantics<parallel>], iteration_bounds = array<i64: 1>, scalar_prefetch = 0 : i64, scratch_operands = 0 : i64, tpu.core_type = #tpu.core_type<tc>, window_params = [{pipeline_mode = #tpu.pipeline_mode<synchronous>, transform_indices = @transform_0, window_bounds = array<i64: 64, 576>}, {pipeline_mode = #tpu.pipeline_mode<synchronous>, transform_indices = @transform_1, window_bounds = array<i64: 64, 1>}, {transform_indices = @transform_2, window_bounds = array<i64: 576, 128>}, {transform_indices = @transform_3, window_bounds = array<i64: 64, 128>}]} {
    %c0 = arith.constant 0 : index
    %c0_0 = arith.constant 0 : index
    %0 = vector.load %arg1[%c0, %c0_0] : memref<64x576xf32, #tpu.memory_space<vmem>>, vector<64x576xf32>
    %c0_1 = arith.constant 0 : index
    %c0_2 = arith.constant 0 : index
    %1 = vector.load %arg3[%c0_1, %c0_2] : memref<576x128xf32, #tpu.memory_space<vmem>>, vector<576x128xf32>
    %cst = arith.constant dense<0.000000e+00> : vector<64x128xf32>
    %2 = tpu.matmul %0, %1, %cst {dimension_numbers = #tpu.dot_dimension_numbers<[1], [0], [0], [1], [0, 0, 1, 1], [], []>} : vector<64x576xf32>, vector<576x128xf32>, vector<64x128xf32> -> vector<64x128xf32>
    %c0_3 = arith.constant 0 : index
    %c0_4 = arith.constant 0 : index
    %3 = vector.load %arg2[%c0_3, %c0_4] : memref<64x1xf32, #tpu.memory_space<vmem>>, vector<64x1xf32>
    %4 = vector.broadcast %3 : vector<64x1xf32> to vector<64x128xf32>
    %5 = arith.addf %2, %4 : vector<64x128xf32>
    %cst_5 = arith.constant 0.000000e+00 : f32
    %6 = vector.broadcast %cst_5 : f32 to vector<64x128xf32>
    %7 = arith.maximumf %5, %6 : vector<64x128xf32>
    %c0_6 = arith.constant 0 : index
    %c0_7 = arith.constant 0 : index
    %8 = vector.load %arg4[%c0_6, %c0_7] : memref<64x128xf32, #tpu.memory_space<vmem>>, vector<64x128xf32>
    tpu.vector_store %arg4[%c0_6, %c0_7], %7 {strides = array<i32>} : memref<64x128xf32, #tpu.memory_space<vmem>>, vector<64x128xf32>,
    return
  }
  func.func @transform_0(%arg0: i32) -> (i32, i32) {
    %c0_i32 = arith.constant 0 : i32
    %c0_i32_0 = arith.constant 0 : i32
    %c0_i32_1 = arith.constant 0 : i32
    return %c0_i32, %c0_i32_0 : i32, i32
  }
  func.func @transform_1(%arg0: i32) -> (i32, i32) {
    %c0_i32 = arith.constant 0 : i32
    %c0_i32_0 = arith.constant 0 : i32
    %c0_i32_1 = arith.constant 0 : i32
    return %c0_i32, %c0_i32_0 : i32, i32
  }
  func.func @transform_2(%arg0: i32) -> (i32, i32) {
    %c0_i32 = arith.constant 0 : i32
    %c0_i32_0 = arith.constant 0 : i32
    return %c0_i32, %arg0 : i32, i32
  }
  func.func @transform_3(%arg0: i32) -> (i32, i32) {
    %c0_i32 = arith.constant 0 : i32
    %c0_i32_0 = arith.constant 0 : i32
    return %c0_i32, %arg0 : i32, i32
  }
}

module attributes {stable_mosaic.version = 11 : i64} {
  func.func @_linear_l2norm_kernel(%arg0: i32, %arg1: memref<8x256xf32, #tpu.memory_space<vmem>>, %arg2: memref<256x64xf32, #tpu.memory_space<vmem>>, %arg3: memref<1x64xf32, #tpu.memory_space<vmem>>, %arg4: memref<8x64xf32, #tpu.memory_space<vmem>>) attributes {dimension_semantics = [#tpu.dimension_semantics<parallel>], iteration_bounds = array<i64: 1>, scalar_prefetch = 0 : i64, scratch_operands = 0 : i64, tpu.core_type = #tpu.core_type<tc>, window_params = [{transform_indices = @transform_0, window_bounds = array<i64: 8, 256>}, {pipeline_mode = #tpu.pipeline_mode<synchronous>, transform_indices = @transform_1, window_bounds = array<i64: 256, 64>}, {pipeline_mode = #tpu.pipeline_mode<synchronous>, transform_indices = @transform_2, window_bounds = array<i64: 1, 64>}, {transform_indices = @transform_3, window_bounds = array<i64: 8, 64>}]} {
    %c0 = arith.constant 0 : index
    %c0_0 = arith.constant 0 : index
    %0 = vector.load %arg1[%c0, %c0_0] : memref<8x256xf32, #tpu.memory_space<vmem>>, vector<8x256xf32>
    %c0_1 = arith.constant 0 : index
    %c0_2 = arith.constant 0 : index
    %1 = vector.load %arg2[%c0_1, %c0_2] : memref<256x64xf32, #tpu.memory_space<vmem>>, vector<256x64xf32>
    %cst = arith.constant dense<0.000000e+00> : vector<8x64xf32>
    %2 = tpu.matmul %0, %1, %cst {dimension_numbers = #tpu.dot_dimension_numbers<[1], [0], [0], [1], [0, 0, 1, 1], [], []>} : vector<8x256xf32>, vector<256x64xf32>, vector<8x64xf32> -> vector<8x64xf32>
    %c0_3 = arith.constant 0 : index
    %c0_4 = arith.constant 0 : index
    %3 = vector.load %arg3[%c0_3, %c0_4] : memref<1x64xf32, #tpu.memory_space<vmem>>, vector<1x64xf32>
    %4 = vector.broadcast %3 : vector<1x64xf32> to vector<8x64xf32>
    %5 = arith.addf %2, %4 : vector<8x64xf32>
    %6 = arith.mulf %5, %5 : vector<8x64xf32>
    %cst_5 = arith.constant dense<0.000000e+00> : vector<8xf32>
    %7 = vector.multi_reduction <add>, %6, %cst_5 [1] : vector<8x64xf32> to vector<8xf32>
    %8 = vector.shape_cast %7 : vector<8xf32> to vector<8x1xf32>
    %cst_6 = arith.constant 1.000000e-24 : f32
    %9 = vector.broadcast %cst_6 : f32 to vector<8x1xf32>
    %10 = arith.maximumf %8, %9 : vector<8x1xf32>
    %11 = math.rsqrt %10 : vector<8x1xf32>
    %12 = vector.broadcast %11 : vector<8x1xf32> to vector<8x64xf32>
    %13 = arith.mulf %5, %12 : vector<8x64xf32>
    %c0_7 = arith.constant 0 : index
    %c0_8 = arith.constant 0 : index
    %14 = vector.load %arg4[%c0_7, %c0_8] : memref<8x64xf32, #tpu.memory_space<vmem>>, vector<8x64xf32>
    tpu.vector_store %arg4[%c0_7, %c0_8], %13 {strides = array<i32>} : memref<8x64xf32, #tpu.memory_space<vmem>>, vector<8x64xf32>,
    return
  }
  func.func @transform_0(%arg0: i32) -> (i32, i32) {
    %c0_i32 = arith.constant 0 : i32
    %c0_i32_0 = arith.constant 0 : i32
    return %arg0, %c0_i32 : i32, i32
  }
  func.func @transform_1(%arg0: i32) -> (i32, i32) {
    %c0_i32 = arith.constant 0 : i32
    %c0_i32_0 = arith.constant 0 : i32
    %c0_i32_1 = arith.constant 0 : i32
    return %c0_i32, %c0_i32_0 : i32, i32
  }
  func.func @transform_2(%arg0: i32) -> (i32, i32) {
    %c0_i32 = arith.constant 0 : i32
    %c0_i32_0 = arith.constant 0 : i32
    %c0_i32_1 = arith.constant 0 : i32
    return %c0_i32, %c0_i32_0 : i32, i32
  }
  func.func @transform_3(%arg0: i32) -> (i32, i32) {
    %c0_i32 = arith.constant 0 : i32
    %c0_i32_0 = arith.constant 0 : i32
    return %arg0, %c0_i32 : i32, i32
  }
}

</mosaic_0001>

<bundles_post_ra>
// kernel: fe_forward.5
= control target key start
LH: loop header
LB: loop body
LE: loop exit
PB: predicated region body
PF: predicated region fallthrough
CT: control target
= control target key end

     0   :  { %s905_s12 = smov 0   ;;  %s907_s13 = smov 0   ;;  %s1331_s0 = inlined_call_operand.vmem [shape: f32[16,192], index: 0, kind: input, shape index: {}]   ;;  %s1332_s1 = inlined_call_operand.vmem [shape: f32[16,1], index: 1, kind: input, shape index: {}]   ;;  %s1333_s2 = inlined_call_operand.vmem [shape: f32[192,2048], index: 2, kind: input, shape index: {}]   ;;  %s1334_s3 = inlined_call_operand.vmem [shape: f32[16,2048], index: 3, kind: output, shape index: {}]  }
   0x1   :  { %s909_s14 = smov 0  }
   0x2 LB: > { %s793_s15 = sadd.s32 4294967295, %s882_s14   ;;  %s922_s16 = sadd.s32 1, %s882_s14   ;;  %s882_s14 = sphi %s909_s14, %s1338_s14   ;;  %s878_s13 = sphi %s907_s13, %s1337_s13   ;;  %s874_s12 = sphi %s905_s12, %s1336_s12  }
   0x3   : > { %s59_s17 = ssub.s32 %s882_s14, %s922_s16  ;;  %s62_s18 = sadd.s32 1, %s878_s13 }
   0x4   : > { %p60_p0 = scmp.eq.s32.totalorder %s59_s17, 0  ;;  %p69_p1 = scmp.ne.s32.totalorder %s878_s13, %s874_s12 }
   0x5   : > { %p70_p2 = scmp.eq.s32.totalorder %s882_s14, 0  ;;  %p99_p3 = scmp.eq.s32.totalorder %s793_s15, 3 }
   0x6   : > { %s933_s19 = scalar_select %p60_p0, %s878_s13, %s62_s18  }
   0x7   : > { %p71_p4 = por %p70_p2, %p69_p1  ;;  %p935_p5 = por %p99_p3, %p69_p1 }
   0x8   : > { %p796_p6 = scmp.ge.s32.totalorder %s882_s14, 4 }
   0xa   : > { %127 = sbr.rel (%p796_p6) target bundleno = 115 (0x73), region = 24 }
   0xf   : > { %130 = sbr.rel (!%p71_p4) target bundleno = 115 (0x73), region = 28  ;;  %s132_s21 = sand.u32 (%p71_p4), 1, %s878_s13  }
  0x10   : > { %s814_s22 = sshll.u32 (%p71_p4), %s882_s14, 5  ;;  %s832_s23 = smul.u32 (%p71_p4), 768, %s132_s21 }
  0x11   : > { %s945_s26 = scalar_lea.vmem (%p71_p4), %s1333_s2, %s814_s22 }
  0x12   : > { %v150_v0 = vld [vmem:[%s945_s26] sm:$0xff] (%p71_p4)  ;;  %v152_v1 = vld [vmem:[%s945_s26 + $0x8] sm:$0xff] (%p71_p4)  ;;  %v154_v2 = vld [vmem:[%s945_s26 + $0x10] sm:$0xff] (%p71_p4)  ;;  %s950_s27 = scalar_lea.vmem (%p71_p4), [#allocation2], %s832_s23 }
  0x13   : > { %151 = vst [vmem:[%s950_s27] sm:$0xff] (%p71_p4), %v150_v0  ;;  %v156_v3 = vld [vmem:[%s945_s26 + $0x18] sm:$0xff] (%p71_p4)  ;;  %v158_v4 = vld [vmem:[%s945_s26 + $0x80] sm:$0xff] (%p71_p4)  ;;  %v160_v5 = vld [vmem:[%s945_s26 + $0x88] sm:$0xff] (%p71_p4) }
  0x14   : > { %153 = vst [vmem:[%s950_s27 + $0x8] sm:$0xff] %v152_v1  ;;  %v162_v6 = vld [vmem:[%s945_s26 + $0x90] sm:$0xff]  ;;  %v164_v7 = vld [vmem:[%s945_s26 + $0x98] sm:$0xff]  ;;  %v166_v8 = vld [vmem:[%s945_s26 + $0x100] sm:$0xff] }
  0x15   : > { %155 = vst [vmem:[%s950_s27 + $0x10] sm:$0xff] %v154_v2  ;;  %v168_v9 = vld [vmem:[%s945_s26 + $0x108] sm:$0xff]  ;;  %v170_v10 = vld [vmem:[%s945_s26 + $0x110] sm:$0xff]  ;;  %v172_v11 = vld [vmem:[%s945_s26 + $0x118] sm:$0xff] }
  0x16   : > { %157 = vst [vmem:[%s950_s27 + $0x18] sm:$0xff] %v156_v3  ;;  %v174_v12 = vld [vmem:[%s945_s26 + $0x180] sm:$0xff]  ;;  %v176_v13 = vld [vmem:[%s945_s26 + $0x188] sm:$0xff]  ;;  %v178_v14 = vld [vmem:[%s945_s26 + $0x190] sm:$0xff] }
  0x17   : > { %159 = vst [vmem:[%s950_s27 + $0x20] sm:$0xff] %v158_v4  ;;  %v180_v15 = vld [vmem:[%s945_s26 + $0x198] sm:$0xff]  ;;  %v182_v16 = vld [vmem:[%s945_s26 + $0x200] sm:$0xff]  ;;  %v184_v17 = vld [vmem:[%s945_s26 + $0x208] sm:$0xff] }
  0x18   : > { %161 = vst [vmem:[%s950_s27 + $0x28] sm:$0xff] %v160_v5  ;;  %v186_v18 = vld [vmem:[%s945_s26 + $0x210] sm:$0xff]  ;;  %v188_v19 = vld [vmem:[%s945_s26 + $0x218] sm:$0xff]  ;;  %v190_v20 = vld [vmem:[%s945_s26 + $0x280] sm:$0xff] }
  0x19   : > { %163 = vst [vmem:[%s950_s27 + $0x30] sm:$0xff] %v162_v6  ;;  %v192_v21 = vld [vmem:[%s945_s26 + $0x288] sm:$0xff]  ;;  %v194_v22 = vld [vmem:[%s945_s26 + $0x290] sm:$0xff]  ;;  %v196_v23 = vld [vmem:[%s945_s26 + $0x298] sm:$0xff] }
  0x1a   : > { %165 = vst [vmem:[%s950_s27 + $0x38] sm:$0xff] %v164_v7  ;;  %v198_v24 = vld [vmem:[%s945_s26 + $0x300] sm:$0xff]  ;;  %v200_v25 = vld [vmem:[%s945_s26 + $0x308] sm:$0xff]  ;;  %v202_v26 = vld [vmem:[%s945_s26 + $0x310] sm:$0xff] }
  0x1b   : > { %167 = vst [vmem:[%s950_s27 + $0x40] sm:$0xff] %v166_v8  ;;  %v204_v27 = vld [vmem:[%s945_s26 + $0x318] sm:$0xff]  ;;  %v206_v28 = vld [vmem:[%s945_s26 + $0x380] sm:$0xff]  ;;  %v208_v29 = vld [vmem:[%s945_s26 + $0x388] sm:$0xff] }
  0x1c   : > { %169 = vst [vmem:[%s950_s27 + $0x48] sm:$0xff] %v168_v9  ;;  %v210_v30 = vld [vmem:[%s945_s26 + $0x390] sm:$0xff]  ;;  %v212_v31 = vld [vmem:[%s945_s26 + $0x398] sm:$0xff]  ;;  %v214_v32 = vld [vmem:[%s945_s26 + $0x400] sm:$0xff] }
  0x1d   : > { %171 = vst [vmem:[%s950_s27 + $0x50] sm:$0xff] %v170_v10  ;;  %v216_v33 = vld [vmem:[%s945_s26 + $0x408] sm:$0xff]  ;;  %v218_v34 = vld [vmem:[%s945_s26 + $0x410] sm:$0xff]  ;;  %v220_v35 = vld [vmem:[%s945_s26 + $0x418] sm:$0xff] }
  0x1e   : > { %173 = vst [vmem:[%s950_s27 + $0x58] sm:$0xff] %v172_v11  ;;  %v222_v36 = vld [vmem:[%s945_s26 + $0x480] sm:$0xff]  ;;  %v224_v37 = vld [vmem:[%s945_s26 + $0x488] sm:$0xff]  ;;  %v226_v38 = vld [vmem:[%s945_s26 + $0x490] sm:$0xff] }
  0x1f   : > { %175 = vst [vmem:[%s950_s27 + $0x60] sm:$0xff] %v174_v12  ;;  %v228_v39 = vld [vmem:[%s945_s26 + $0x498] sm:$0xff]  ;;  %v230_v40 = vld [vmem:[%s945_s26 + $0x500] sm:$0xff]  ;;  %v232_v41 = vld [vmem:[%s945_s26 + $0x508] sm:$0xff] }
  0x20   : > { %177 = vst [vmem:[%s950_s27 + $0x68] sm:$0xff] %v176_v13  ;;  %v234_v42 = vld [vmem:[%s945_s26 + $0x510] sm:$0xff]  ;;  %v236_v43 = vld [vmem:[%s945_s26 + $0x518] sm:$0xff]  ;;  %v238_v44 = vld [vmem:[%s945_s26 + $0x580] sm:$0xff] }
  0x21   : > { %179 = vst [vmem:[%s950_s27 + $0x70] sm:$0xff] %v178_v14  ;;  %v240_v45 = vld [vmem:[%s945_s26 + $0x588] sm:$0xff]  ;;  %v242_v46 = vld [vmem:[%s945_s26 + $0x590] sm:$0xff]  ;;  %v244_v47 = vld [vmem:[%s945_s26 + $0x598] sm:$0xff] }
  0x22   : > { %181 = vst [vmem:[%s950_s27 + $0x78] sm:$0xff] %v180_v15  ;;  %v246_v48 = vld [vmem:[%s945_s26 + $0x600] sm:$0xff]  ;;  %v248_v49 = vld [vmem:[%s945_s26 + $0x608] sm:$0xff]  ;;  %v250_v50 = vld [vmem:[%s945_s26 + $0x610] sm:$0xff] }
  0x23   : > { %183 = vst [vmem:[%s950_s27 + $0x80] sm:$0xff] %v182_v16  ;;  %v252_v51 = vld [vmem:[%s945_s26 + $0x618] sm:$0xff]  ;;  %v254_v52 = vld [vmem:[%s945_s26 + $0x680] sm:$0xff]  ;;  %v256_v53 = vld [vmem:[%s945_s26 + $0x688] sm:$0xff] }
  0x24   : > { %185 = vst [vmem:[%s950_s27 + $0x88] sm:$0xff] %v184_v17  ;;  %v258_v54 = vld [vmem:[%s945_s26 + $0x690] sm:$0xff]  ;;  %v260_v55 = vld [vmem:[%s945_s26 + $0x698] sm:$0xff]  ;;  %v262_v56 = vld [vmem:[%s945_s26 + $0x700] sm:$0xff] }
  0x25   : > { %187 = vst [vmem:[%s950_s27 + $0x90] sm:$0xff] %v186_v18  ;;  %v264_v57 = vld [vmem:[%s945_s26 + $0x708] sm:$0xff]  ;;  %v266_v58 = vld [vmem:[%s945_s26 + $0x710] sm:$0xff]  ;;  %v268_v59 = vld [vmem:[%s945_s26 + $0x718] sm:$0xff] }
  0x26   : > { %189 = vst [vmem:[%s950_s27 + $0x98] sm:$0xff] %v188_v19  ;;  %v270_v60 = vld [vmem:[%s945_s26 + $0x780] sm:$0xff]  ;;  %v272_v61 = vld [vmem:[%s945_s26 + $0x788] sm:$0xff]  ;;  %v274_v62 = vld [vmem:[%s945_s26 + $0x790] sm:$0xff] }
  0x27   : > { %191 = vst [vmem:[%s950_s27 + $0xa0] sm:$0xff] %v190_v20  ;;  %v276_v63 = vld [vmem:[%s945_s26 + $0x798] sm:$0xff]  ;;  %v278_v0 = vld [vmem:[%s945_s26 + $0x800] sm:$0xff]  ;;  %v280_v1 = vld [vmem:[%s945_s26 + $0x808] sm:$0xff] }
  0x28   : > { %193 = vst [vmem:[%s950_s27 + $0xa8] sm:$0xff] %v192_v21  ;;  %v282_v2 = vld [vmem:[%s945_s26 + $0x810] sm:$0xff]  ;;  %v284_v3 = vld [vmem:[%s945_s26 + $0x818] sm:$0xff]  ;;  %v286_v4 = vld [vmem:[%s945_s26 + $0x880] sm:$0xff] }
  0x29   : > { %195 = vst [vmem:[%s950_s27 + $0xb0] sm:$0xff] %v194_v22  ;;  %v288_v5 = vld [vmem:[%s945_s26 + $0x888] sm:$0xff]  ;;  %v290_v6 = vld [vmem:[%s945_s26 + $0x890] sm:$0xff]  ;;  %v292_v7 = vld [vmem:[%s945_s26 + $0x898] sm:$0xff] }
  0x2a   : > { %197 = vst [vmem:[%s950_s27 + $0xb8] sm:$0xff] %v196_v23  ;;  %v294_v8 = vld [vmem:[%s945_s26 + $0x900] sm:$0xff]  ;;  %v296_v9 = vld [vmem:[%s945_s26 + $0x908] sm:$0xff]  ;;  %v298_v10 = vld [vmem:[%s945_s26 + $0x910] sm:$0xff] }
  0x2b   : > { %199 = vst [vmem:[%s950_s27 + $0xc0] sm:$0xff] %v198_v24  ;;  %v300_v11 = vld [vmem:[%s945_s26 + $0x918] sm:$0xff]  ;;  %v302_v12 = vld [vmem:[%s945_s26 + $0x980] sm:$0xff]  ;;  %v304_v13 = vld [vmem:[%s945_s26 + $0x988] sm:$0xff] }
  0x2c   : > { %201 = vst [vmem:[%s950_s27 + $0xc8] sm:$0xff] %v200_v25  ;;  %v306_v14 = vld [vmem:[%s945_s26 + $0x990] sm:$0xff]  ;;  %v308_v15 = vld [vmem:[%s945_s26 + $0x998] sm:$0xff]  ;;  %v310_v16 = vld [vmem:[%s945_s26 + $0xa00] sm:$0xff] }
  0x2d   : > { %203 = vst [vmem:[%s950_s27 + $0xd0] sm:$0xff] %v202_v26  ;;  %v312_v17 = vld [vmem:[%s945_s26 + $0xa08] sm:$0xff]  ;;  %v314_v18 = vld [vmem:[%s945_s26 + $0xa10] sm:$0xff]  ;;  %v316_v19 = vld [vmem:[%s945_s26 + $0xa18] sm:$0xff] }
  0x2e   : > { %205 = vst [vmem:[%s950_s27 + $0xd8] sm:$0xff] %v204_v27  ;;  %v318_v20 = vld [vmem:[%s945_s26 + $0xa80] sm:$0xff]  ;;  %v320_v21 = vld [vmem:[%s945_s26 + $0xa88] sm:$0xff]  ;;  %v322_v22 = vld [vmem:[%s945_s26 + $0xa90] sm:$0xff] }
  0x2f   : > { %207 = vst [vmem:[%s950_s27 + $0xe0] sm:$0xff] %v206_v28  ;;  %v324_v23 = vld [vmem:[%s945_s26 + $0xa98] sm:$0xff]  ;;  %v326_v24 = vld [vmem:[%s945_s26 + $0xb00] sm:$0xff]  ;;  %v328_v25 = vld [vmem:[%s945_s26 + $0xb08] sm:$0xff] }
  0x30   : > { %209 = vst [vmem:[%s950_s27 + $0xe8] sm:$0xff] %v208_v29  ;;  %v330_v26 = vld [vmem:[%s945_s26 + $0xb10] sm:$0xff]  ;;  %v332_v27 = vld [vmem:[%s945_s26 + $0xb18] sm:$0xff]  ;;  %v334_v28 = vld [vmem:[%s945_s26 + $0xb80] sm:$0xff] }
  0x31   : > { %211 = vst [vmem:[%s950_s27 + $0xf0] sm:$0xff] %v210_v30  ;;  %v336_v29 = vld [vmem:[%s945_s26 + $0xb88] sm:$0xff]  ;;  %v338_v30 = vld [vmem:[%s945_s26 + $0xb90] sm:$0xff] }
  0x32   : > { %213 = vst [vmem:[%s950_s27 + $0xf8] sm:$0xff] %v212_v31  ;;  %v340_v31 = vld [vmem:[%s945_s26 + $0xb98] sm:$0xff] }
  0x33   : > { %215 = vst [vmem:[%s950_s27 + $0x100] sm:$0xff] %v214_v32 }
  0x34   : > { %217 = vst [vmem:[%s950_s27 + $0x108] sm:$0xff] %v216_v33 }
  0x35   : > { %219 = vst [vmem:[%s950_s27 + $0x110] sm:$0xff] %v218_v34 }
  0x36   : > { %221 = vst [vmem:[%s950_s27 + $0x118] sm:$0xff] %v220_v35 }
  0x37   : > { %223 = vst [vmem:[%s950_s27 + $0x120] sm:$0xff] %v222_v36 }
  0x38   : > { %225 = vst [vmem:[%s950_s27 + $0x128] sm:$0xff] %v224_v37 }
  0x39   : > { %227 = vst [vmem:[%s950_s27 + $0x130] sm:$0xff] %v226_v38 }
  0x3a   : > { %229 = vst [vmem:[%s950_s27 + $0x138] sm:$0xff] %v228_v39 }
  0x3b   : > { %231 = vst [vmem:[%s950_s27 + $0x140] sm:$0xff] %v230_v40 }
  0x3c   : > { %233 = vst [vmem:[%s950_s27 + $0x148] sm:$0xff] %v232_v41 }
  0x3d   : > { %235 = vst [vmem:[%s950_s27 + $0x150] sm:$0xff] %v234_v42 }
  0x3e   : > { %237 = vst [vmem:[%s950_s27 + $0x158] sm:$0xff] %v236_v43 }
  0x3f   : > { %239 = vst [vmem:[%s950_s27 + $0x160] sm:$0xff] %v238_v44 }
  0x40   : > { %241 = vst [vmem:[%s950_s27 + $0x168] sm:$0xff] %v240_v45 }
  0x41   : > { %243 = vst [vmem:[%s950_s27 + $0x170] sm:$0xff] %v242_v46 }
  0x42   : > { %245 = vst [vmem:[%s950_s27 + $0x178] sm:$0xff] %v244_v47 }
  0x43   : > { %247 = vst [vmem:[%s950_s27 + $0x180] sm:$0xff] %v246_v48 }
  0x44   : > { %249 = vst [vmem:[%s950_s27 + $0x188] sm:$0xff] %v248_v49 }
  0x45   : > { %251 = vst [vmem:[%s950_s27 + $0x190] sm:$0xff] %v250_v50 }
  0x46   : > { %253 = vst [vmem:[%s950_s27 + $0x198] sm:$0xff] %v252_v51 }
  0x47   : > { %255 = vst [vmem:[%s950_s27 + $0x1a0] sm:$0xff] %v254_v52 }
  0x48   : > { %257 = vst [vmem:[%s950_s27 + $0x1a8] sm:$0xff] %v256_v53 }
  0x49   : > { %259 = vst [vmem:[%s950_s27 + $0x1b0] sm:$0xff] %v258_v54 }
  0x4a   : > { %261 = vst [vmem:[%s950_s27 + $0x1b8] sm:$0xff] %v260_v55 }
  0x4b   : > { %263 = vst [vmem:[%s950_s27 + $0x1c0] sm:$0xff] %v262_v56 }
  0x4c   : > { %265 = vst [vmem:[%s950_s27 + $0x1c8] sm:$0xff] %v264_v57 }
  0x4d   : > { %267 = vst [vmem:[%s950_s27 + $0x1d0] sm:$0xff] %v266_v58 }
  0x4e   : > { %269 = vst [vmem:[%s950_s27 + $0x1d8] sm:$0xff] %v268_v59 }
  0x4f   : > { %271 = vst [vmem:[%s950_s27 + $0x1e0] sm:$0xff] %v270_v60 }
  0x50   : > { %273 = vst [vmem:[%s950_s27 + $0x1e8] sm:$0xff] %v272_v61 }
  0x51   : > { %275 = vst [vmem:[%s950_s27 + $0x1f0] sm:$0xff] %v274_v62 }
  0x52   : > { %277 = vst [vmem:[%s950_s27 + $0x1f8] sm:$0xff] %v276_v63 }
  0x53   : > { %279 = vst [vmem:[%s950_s27 + $0x200] sm:$0xff] %v278_v0 }
  0x54   : > { %281 = vst [vmem:[%s950_s27 + $0x208] sm:$0xff] %v280_v1 }
  0x55   : > { %283 = vst [vmem:[%s950_s27 + $0x210] sm:$0xff] %v282_v2 }
  0x56   : > { %285 = vst [vmem:[%s950_s27 + $0x218] sm:$0xff] %v284_v3 }
  0x57   : > { %287 = vst [vmem:[%s950_s27 + $0x220] sm:$0xff] %v286_v4 }
  0x58   : > { %289 = vst [vmem:[%s950_s27 + $0x228] sm:$0xff] %v288_v5 }
  0x59   : > { %291 = vst [vmem:[%s950_s27 + $0x230] sm:$0xff] %v290_v6 }
  0x5a   : > { %293 = vst [vmem:[%s950_s27 + $0x238] sm:$0xff] %v292_v7 }
  0x5b   : > { %295 = vst [vmem:[%s950_s27 + $0x240] sm:$0xff] %v294_v8 }
  0x5c   : > { %297 = vst [vmem:[%s950_s27 + $0x248] sm:$0xff] %v296_v9 }
  0x5d   : > { %299 = vst [vmem:[%s950_s27 + $0x250] sm:$0xff] %v298_v10 }
  0x5e   : > { %301 = vst [vmem:[%s950_s27 + $0x258] sm:$0xff] %v300_v11 }
  0x5f   : > { %303 = vst [vmem:[%s950_s27 + $0x260] sm:$0xff] %v302_v12 }
  0x60   : > { %305 = vst [vmem:[%s950_s27 + $0x268] sm:$0xff] %v304_v13 }
  0x61   : > { %307 = vst [vmem:[%s950_s27 + $0x270] sm:$0xff] %v306_v14 }
  0x62   : > { %309 = vst [vmem:[%s950_s27 + $0x278] sm:$0xff] %v308_v15 }
  0x63   : > { %311 = vst [vmem:[%s950_s27 + $0x280] sm:$0xff] %v310_v16 }
  0x64   : > { %313 = vst [vmem:[%s950_s27 + $0x288] sm:$0xff] %v312_v17 }
  0x65   : > { %315 = vst [vmem:[%s950_s27 + $0x290] sm:$0xff] %v314_v18 }
  0x66   : > { %317 = vst [vmem:[%s950_s27 + $0x298] sm:$0xff] %v316_v19 }
  0x67   : > { %319 = vst [vmem:[%s950_s27 + $0x2a0] sm:$0xff] %v318_v20 }
  0x68   : > { %321 = vst [vmem:[%s950_s27 + $0x2a8] sm:$0xff] %v320_v21 }
  0x69   : > { %323 = vst [vmem:[%s950_s27 + $0x2b0] sm:$0xff] %v322_v22 }
  0x6a   : > { %325 = vst [vmem:[%s950_s27 + $0x2b8] sm:$0xff] %v324_v23 }
  0x6b   : > { %327 = vst [vmem:[%s950_s27 + $0x2c0] sm:$0xff] %v326_v24 }
  0x6c   : > { %329 = vst [vmem:[%s950_s27 + $0x2c8] sm:$0xff] %v328_v25 }
  0x6d   : > { %331 = vst [vmem:[%s950_s27 + $0x2d0] sm:$0xff] %v330_v26 }
  0x6e   : > { %333 = vst [vmem:[%s950_s27 + $0x2d8] sm:$0xff] %v332_v27 }
  0x6f   : > { %335 = vst [vmem:[%s950_s27 + $0x2e0] sm:$0xff] %v334_v28 }
  0x70   : > { %337 = vst [vmem:[%s950_s27 + $0x2e8] sm:$0xff] %v336_v29 }
  0x71   : > { %339 = vst [vmem:[%s950_s27 + $0x2f0] sm:$0xff] %v338_v30 }
  0x72   : > { %341 = vst [vmem:[%s950_s27 + $0x2f8] sm:$0xff] %v340_v31 }
  0x73 PF: > { %p799_p7 = scmp.ge.s32.totalorder %s882_s14, 1  ;;  %p346_p8 = scmp.lt.s32.totalorder %s882_s14, 5 }
  0x75   : > { %p347_p9 = pnand %p799_p7, %p346_p8 }
  0x76   : > { %s353_s28 = sand.u32 (!%p347_p9), 1, %s874_s12  }
  0x77   : > { %350 = sbr.rel (%p347_p9) target bundleno = 338 (0x152), region = 51  ;;  %s800_s23 = sshll.u32 (!%p347_p9), %s353_s28, 6 }
  0x78   : > { %s833_s29 = smul.u32 (!%p347_p9), 768, %s353_s28  ;;  %s1296_s24 = scalar_lea.vmem (!%p347_p9), [#allocation3], %s800_s23 }
  0x7a   : > { %s1146_s30 = scalar_lea.vmem (!%p347_p9), [#allocation2], %s833_s29 }
  0x7c   : > { %v441_v32 = vld [vmem:[%s1146_s30 + $0x1e0] sm:$0xff]  ;;  %v442_v33 = vld [vmem:[%s1146_s30 + $0x1e8] sm:$0xff]  ;;  %v475_v63 = vld [vmem:[%s1146_s30 + $0x2f0] sm:$0xff]  ;;  %vm489_vm0 = vcmask 523264   ;;  %s815_s12 = sshll.u32 (%p935_p5), %s793_s15, 5 }
  0x7d   : > { %v474_v34 = vld [vmem:[%s1146_s30 + $0x2e8] sm:$0xff]  ;;  %496 = vmatpush.msra.mxu0 %v441_v32  ;;  %542 = vmatpush.msra.mxu2 %v442_v33  ;;  %v437_v35 = vld [vmem:[%s1146_s30 + $0x1c0] sm:$0xff]  ;;  %v471_v3 = vld [vmem:[%s1146_s30 + $0x2d0] sm:$0xff]  ;;  %s705_s27 = scalar_lea.vmem (%p935_p5), %s1334_s3, %s815_s12 }
  0x7e   : > { %v438_v36 = vld [vmem:[%s1146_s30 + $0x1c8] sm:$0xff]  ;;  %573 = vmatpush.msra.mxu3 %v474_v34  ;;  %v473_v38 = vld [vmem:[%s1146_s30 + $0x2e0] sm:$0xff]  ;;  %v443_v6 = vld [vmem:[%s1146_s30 + $0x1f0] sm:$0xff] }
  0x7f   : > { %v470_v37 = vld [vmem:[%s1146_s30 + $0x2c8] sm:$0xff]  ;;  %v433_v39 = vld [vmem:[%s1146_s30 + $0x1a0] sm:$0xff]  ;;  %497 = vmatpush.msra.mxu0 %v437_v35  ;;  %543 = vmatpush.msra.mxu2 %v438_v36  ;;  %v467_v7 = vld [vmem:[%s1146_s30 + $0x2b0] sm:$0xff] }
  0x80   : > { %v434_v40 = vld [vmem:[%s1146_s30 + $0x1a8] sm:$0xff]  ;;  %v469_v42 = vld [vmem:[%s1146_s30 + $0x2c0] sm:$0xff]  ;;  %574 = vmatpush.msra.mxu3 %v470_v37  ;;  %527 = vmatpush.msra.mxu1 %v473_v38  ;;  %v439_v10 = vld [vmem:[%s1146_s30 + $0x1d0] sm:$0xff] }
  0x81   : > { %v466_v41 = vld [vmem:[%s1146_s30 + $0x2a8] sm:$0xff]  ;;  %v429_v43 = vld [vmem:[%s1146_s30 + $0x180] sm:$0xff]  ;;  %498 = vmatpush.msra.mxu0 %v433_v39  ;;  %544 = vmatpush.msra.mxu2 %v434_v40  ;;  %v463_v11 = vld [vmem:[%s1146_s30 + $0x290] sm:$0xff] }
  0x82   : > { %v430_v44 = vld [vmem:[%s1146_s30 + $0x188] sm:$0xff]  ;;  %v465_v46 = vld [vmem:[%s1146_s30 + $0x2a0] sm:$0xff]  ;;  %575 = vmatpush.msra.mxu3 %v466_v41  ;;  %528 = vmatpush.msra.mxu1 %v469_v42  ;;  %v435_v14 = vld [vmem:[%s1146_s30 + $0x1b0] sm:$0xff] }
  0x83   : > { %v462_v45 = vld [vmem:[%s1146_s30 + $0x288] sm:$0xff]  ;;  %v425_v47 = vld [vmem:[%s1146_s30 + $0x160] sm:$0xff]  ;;  %499 = vmatpush.msra.mxu0 %v429_v43  ;;  %545 = vmatpush.msra.mxu2 %v430_v44  ;;  %v459_v15 = vld [vmem:[%s1146_s30 + $0x270] sm:$0xff] }
  0x84   : > { %v426_v48 = vld [vmem:[%s1146_s30 + $0x168] sm:$0xff]  ;;  %v461_v50 = vld [vmem:[%s1146_s30 + $0x280] sm:$0xff]  ;;  %576 = vmatpush.msra.mxu3 %v462_v45  ;;  %529 = vmatpush.msra.mxu1 %v465_v46  ;;  %v431_v18 = vld [vmem:[%s1146_s30 + $0x190] sm:$0xff] }
  0x85   : > { %v458_v49 = vld [vmem:[%s1146_s30 + $0x268] sm:$0xff]  ;;  %v421_v51 = vld [vmem:[%s1146_s30 + $0x140] sm:$0xff]  ;;  %500 = vmatpush.msra.mxu0 %v425_v47  ;;  %546 = vmatpush.msra.mxu2 %v426_v48  ;;  %v455_v19 = vld [vmem:[%s1146_s30 + $0x250] sm:$0xff] }
  0x86   : > { %v422_v52 = vld [vmem:[%s1146_s30 + $0x148] sm:$0xff]  ;;  %v457_v54 = vld [vmem:[%s1146_s30 + $0x260] sm:$0xff]  ;;  %577 = vmatpush.msra.mxu3 %v458_v49  ;;  %530 = vmatpush.msra.mxu1 %v461_v50  ;;  %v427_v22 = vld [vmem:[%s1146_s30 + $0x170] sm:$0xff] }
  0x87   : > { %v454_v53 = vld [vmem:[%s1146_s30 + $0x248] sm:$0xff]  ;;  %v417_v55 = vld [vmem:[%s1146_s30 + $0x120] sm:$0xff]  ;;  %501 = vmatpush.msra.mxu0 %v421_v51  ;;  %547 = vmatpush.msra.mxu2 %v422_v52  ;;  %v451_v23 = vld [vmem:[%s1146_s30 + $0x230] sm:$0xff] }
  0x88   : > { %v418_v56 = vld [vmem:[%s1146_s30 + $0x128] sm:$0xff]  ;;  %v453_v58 = vld [vmem:[%s1146_s30 + $0x240] sm:$0xff]  ;;  %578 = vmatpush.msra.mxu3 %v454_v53  ;;  %531 = vmatpush.msra.mxu1 %v457_v54  ;;  %v423_v26 = vld [vmem:[%s1146_s30 + $0x150] sm:$0xff] }
  0x89   : > { %v450_v57 = vld [vmem:[%s1146_s30 + $0x228] sm:$0xff]  ;;  %v413_v59 = vld [vmem:[%s1146_s30 + $0x100] sm:$0xff]  ;;  %502 = vmatpush.msra.mxu0 %v417_v55  ;;  %548 = vmatpush.msra.mxu2 %v418_v56  ;;  %v447_v29 = vld [vmem:[%s1146_s30 + $0x210] sm:$0xff] }
  0x8a   : > { %v414_v60 = vld [vmem:[%s1146_s30 + $0x108] sm:$0xff]  ;;  %v449_v62 = vld [vmem:[%s1146_s30 + $0x220] sm:$0xff]  ;;  %579 = vmatpush.msra.mxu3 %v450_v57  ;;  %532 = vmatpush.msra.mxu1 %v453_v58  ;;  %v419_v31 = vld [vmem:[%s1146_s30 + $0x130] sm:$0xff] }
  0x8b   : > { %v446_v61 = vld [vmem:[%s1146_s30 + $0x208] sm:$0xff]  ;;  %v409_v0 = vld [vmem:[%s1146_s30 + $0xe0] sm:$0xff]  ;;  %503 = vmatpush.msra.mxu0 %v413_v59  ;;  %549 = vmatpush.msra.mxu2 %v414_v60  ;;  %v444_v32 = vld [vmem:[%s1146_s30 + $0x1f8] sm:$0xff]  ;;  %v884_v59 = vmov 0  }
  0x8c   : > { %v410_v1 = vld [vmem:[%s1146_s30 + $0xe8] sm:$0xff]  ;;  %v445_v2 = vld [vmem:[%s1146_s30 + $0x200] sm:$0xff]  ;;  %580 = vmatpush.msra.mxu3 %v446_v61  ;;  %533 = vmatpush.msra.mxu1 %v449_v62  ;;  %v415_v34 = vld [vmem:[%s1146_s30 + $0x110] sm:$0xff] }
  0x8d   : > { %v405_v4 = vld [vmem:[%s1146_s30 + $0xc0] sm:$0xff]  ;;  %504 = vmatpush.msra.mxu0 %v409_v0  ;;  %v406_v5 = vld [vmem:[%s1146_s30 + $0xc8] sm:$0xff]  ;;  %550 = vmatpush.msra.mxu2 %v410_v1  ;;  %v440_v35 = vld [vmem:[%s1146_s30 + $0x1d8] sm:$0xff] }
  0x8e   : > { %619 = vmatpush.msrb.mxu3 %v475_v63  ;;  %534 = vmatpush.msra.mxu1 %v445_v2  ;;  %v401_v8 = vld [vmem:[%s1146_s30 + $0xa0] sm:$0xff]  ;;  %v402_v9 = vld [vmem:[%s1146_s30 + $0xa8] sm:$0xff]  ;;  %v411_v36 = vld [vmem:[%s1146_s30 + $0xf0] sm:$0xff] }
  0x8f   : > { %505 = vmatpush.msra.mxu0 %v405_v4  ;;  %551 = vmatpush.msra.mxu2 %v406_v5  ;;  %v397_v12 = vld [vmem:[%s1146_s30 + $0x80] sm:$0xff]  ;;  %v398_v13 = vld [vmem:[%s1146_s30 + $0x88] sm:$0xff]  ;;  %v436_v37 = vld [vmem:[%s1146_s30 + $0x1b8] sm:$0xff] }
  0x90   : > { %620 = vmatpush.msrb.mxu3 %v471_v3  ;;  %588 = vmatpush.msrb.mxu1 %v443_v6  ;;  %v393_v16 = vld [vmem:[%s1146_s30 + $0x60] sm:$0xff]  ;;  %v394_v17 = vld [vmem:[%s1146_s30 + $0x68] sm:$0xff]  ;;  %v476_v38 = vld [vmem:[%s1146_s30 + $0x2f8] sm:$0xff] }
  0x91   : > { %506 = vmatpush.msra.mxu0 %v401_v8  ;;  %552 = vmatpush.msra.mxu2 %v402_v9  ;;  %v389_v20 = vld [vmem:[%s1146_s30 + $0x40] sm:$0xff]  ;;  %v390_v21 = vld [vmem:[%s1146_s30 + $0x48] sm:$0xff]  ;;  %v407_v39 = vld [vmem:[%s1146_s30 + $0xd0] sm:$0xff] }
  0x92   : > { %621 = vmatpush.msrb.mxu3 %v467_v7  ;;  %589 = vmatpush.msrb.mxu1 %v439_v10  ;;  %v385_v24 = vld [vmem:[%s1146_s30 + $0x20] sm:$0xff]  ;;  %v386_v25 = vld [vmem:[%s1146_s30 + $0x28] sm:$0xff]  ;;  %v432_v40 = vld [vmem:[%s1146_s30 + $0x198] sm:$0xff] }
  0x93   : > { %507 = vmatpush.msra.mxu0 %v397_v12  ;;  %553 = vmatpush.msra.mxu2 %v398_v13  ;;  %v1210_v27 = vld [vmem:[%s1331_s0 + $0x8] sm:$0xff]  ;;  %v381_v28 = vld [vmem:[%s1146_s30] sm:$0xff]  ;;  %v1237_v41 = vld [vmem:[%s1331_s0 + $0x18] sm:$0xff] }
  0x94   : > { %622 = vmatpush.msrb.mxu3 %v463_v11  ;;  %590 = vmatpush.msrb.mxu1 %v435_v14  ;;  %v382_v30 = vld [vmem:[%s1146_s30 + $0x8] sm:$0xff]  ;;  %v1222_v33 = vld [vmem:[%s1331_s0] sm:$0xff]  ;;  %v403_v42 = vld [vmem:[%s1146_s30 + $0xb0] sm:$0xff] }
  0x95   : > { %508 = vmatpush.msra.mxu0 %v393_v16  ;;  %554 = vmatpush.msra.mxu2 %v394_v17  ;;  %v428_v43 = vld [vmem:[%s1146_s30 + $0x178] sm:$0xff]  ;;  %v1244_v44 = vld [vmem:[%s1331_s0 + $0x10] sm:$0xff]  ;;  %v477_v57 = vld [vmem:[%s1332_s1] sm:$0xff] }
  0x96   : > { %623 = vmatpush.msrb.mxu3 %v459_v15  ;;  %591 = vmatpush.msrb.mxu1 %v431_v18  ;;  %v399_v45 = vld [vmem:[%s1146_s30 + $0x90] sm:$0xff]  ;;  %v424_v46 = vld [vmem:[%s1146_s30 + $0x158] sm:$0xff]  ;;  %v478_v3 = vld [vmem:[%s1332_s1 + $0x8] sm:$0xff] }
  0x97   : > { %509 = vmatpush.msra.mxu0 %v389_v20  ;;  %555 = vmatpush.msra.mxu2 %v390_v21  ;;  %v472_v47 = vld [vmem:[%s1146_s30 + $0x2d8] sm:$0xff]  ;;  %v395_v48 = vld [vmem:[%s1146_s30 + $0x70] sm:$0xff] }
  0x98   : > { %624 = vmatpush.msrb.mxu3 %v455_v19  ;;  %592 = vmatpush.msrb.mxu1 %v427_v22  ;;  %v420_v49 = vld [vmem:[%s1146_s30 + $0x138] sm:$0xff]  ;;  %v391_v51 = vld [vmem:[%s1146_s30 + $0x50] sm:$0xff] }
  0x99   : > { %510 = vmatpush.msra.mxu0 %v385_v24  ;;  %556 = vmatpush.msra.mxu2 %v386_v25  ;;  %v468_v50 = vld [vmem:[%s1146_s30 + $0x2b8] sm:$0xff]  ;;  %v387_v54 = vld [vmem:[%s1146_s30 + $0x30] sm:$0xff] }
  0x9a   : > { %625 = vmatpush.msrb.mxu3 %v451_v23  ;;  %593 = vmatpush.msrb.mxu1 %v423_v26  ;;  %v416_v52 = vld [vmem:[%s1146_s30 + $0x118] sm:$0xff]  ;;  %v383_v58 = vld [vmem:[%s1146_s30 + $0x10] sm:$0xff] }
  0x9b   : > { %803 = vmatmul.msk.f32.vlgmr.msra.gmra.mxu3 %vm489_vm0, %v1210_v27  ;;  %511 = vmatpush.msra.mxu0 %v381_v28  ;;  %v464_v53 = vld [vmem:[%s1146_s30 + $0x298] sm:$0xff] }
  0x9c   : > { %626 = vmatpush.msrb.mxu3 %v447_v29  ;;  %557 = vmatpush.msra.mxu2 %v382_v30  ;;  %v412_v55 = vld [vmem:[%s1146_s30 + $0xf8] sm:$0xff] }
  0x9d   : > { %594 = vmatpush.msrb.mxu1 %v419_v31  ;;  %558 = vmatmul.f32.vlgmr.msra.gmra.mxu2 %v1222_v33  ;;  %v460_v56 = vld [vmem:[%s1146_s30 + $0x278] sm:$0xff] }
  0x9e   : > { %816 = vmatpush.msra.mxu3 %v444_v32  ;;  %634 = vmatpush.msrb.mxu0 %v444_v32  ;;  %v408_v60 = vld [vmem:[%s1146_s30 + $0xd8] sm:$0xff] }
  0x9f   : > { %595 = vmatpush.msrb.mxu1 %v415_v34  ;;  %665 = vmatpush.msrb.mxu2 %v476_v38  ;;  %v456_v61 = vld [vmem:[%s1146_s30 + $0x258] sm:$0xff] }
  0xa0   : > { %817 = vmatpush.msra.mxu3 %v440_v35  ;;  %801 = vmatmul.msk.f32.vlgmr.msra.gmra.mxu1 %vm489_vm0, %v1210_v27  ;;  %v404_v62 = vld [vmem:[%s1146_s30 + $0xb8] sm:$0xff] }
  0xa1   : > { %635 = vmatpush.msrb.mxu0 %v440_v35  ;;  %596 = vmatpush.msrb.mxu1 %v411_v36  ;;  %v452_v63 = vld [vmem:[%s1146_s30 + $0x238] sm:$0xff] }
  0xa2   : > { %818 = vmatpush.msra.mxu3 %v436_v37  ;;  %512 = vmatmul.f32.vlgmr.msra.gmra.mxu0 %v1222_v33  ;;  %v400_v0 = vld [vmem:[%s1146_s30 + $0x98] sm:$0xff] }
  0xa3   : > { %636 = vmatpush.msrb.mxu0 %v436_v37  ;;  %597 = vmatpush.msrb.mxu1 %v407_v39  ;;  %v448_v1 = vld [vmem:[%s1146_s30 + $0x218] sm:$0xff] }
  0xa4   : > { %819 = vmatpush.msra.mxu3 %v432_v40  ;;  %666 = vmatpush.msrb.mxu2 %v472_v47  ;;  %v396_v2 = vld [vmem:[%s1146_s30 + $0x78] sm:$0xff] }
  0xa5   : > { %804 = vmatmul.msk.f32.gmra.mxu3 %vm489_vm0, %v1237_v41  ;;  %637 = vmatpush.msrb.mxu0 %v432_v40  ;;  %v392_v4 = vld [vmem:[%s1146_s30 + $0x58] sm:$0xff] }
  0xa6   : > { %598 = vmatpush.msrb.mxu1 %v403_v42  ;;  %820 = vmatpush.msra.mxu3 %v428_v43  ;;  %v388_v5 = vld [vmem:[%s1146_s30 + $0x38] sm:$0xff] }
  0xa7   : > { %561 = vmatmul.f32.gmra.mxu2 %v1244_v44  ;;  %638 = vmatpush.msrb.mxu0 %v428_v43  ;;  %v384_v6 = vld [vmem:[%s1146_s30 + $0x18] sm:$0xff] }
  0xa8   : > { %599 = vmatpush.msrb.mxu1 %v399_v45  ;;  %821 = vmatpush.msra.mxu3 %v424_v46 }
  0xa9   : > { %802 = vmatmul.msk.f32.gmra.mxu1 %vm489_vm0, %v1237_v41  ;;  %639 = vmatpush.msrb.mxu0 %v424_v46 }
  0xaa   : > { %600 = vmatpush.msrb.mxu1 %v395_v48  ;;  %822 = vmatpush.msra.mxu3 %v420_v49 }
  0xab   : > { %640 = vmatpush.msrb.mxu0 %v420_v49  ;;  %667 = vmatpush.msrb.mxu2 %v468_v50 }
  0xac   : > { %601 = vmatpush.msrb.mxu1 %v391_v51  ;;  %823 = vmatpush.msra.mxu3 %v416_v52 }
  0xad   : > { %805 = vmatmul.msk.f32.vlgmr.msrb.gmra.mxu3 %vm489_vm0, %v1210_v27  ;;  %641 = vmatpush.msrb.mxu0 %v416_v52 }
  0xae   : > { %668 = vmatpush.msrb.mxu2 %v464_v53  ;;  %602 = vmatpush.msrb.mxu1 %v387_v54 }
  0xaf   : > { %824 = vmatpush.msra.mxu3 %v412_v55  ;;  %859 = vset.pattern.permute.xlu0 %v884_v59 }
  0xb0   : > { %642 = vmatpush.msrb.mxu0 %v412_v55  ;;  %669 = vmatpush.msrb.mxu2 %v460_v56 }
  0xb1   : > { %481 = vperm.xlu0 %859, %v477_v57   ;;  %603 = vmatpush.msrb.mxu1 %v383_v58 }
  0xb2   : > { %825 = vmatpush.msra.mxu3 %v408_v60  ;;  %515 = vmatmul.f32.gmra.mxu0 %v1244_v44 }
  0xb3   : > { %604 = vmatmul.f32.vlgmr.msrb.gmra.mxu1 %v1222_v33  ;;  %643 = vmatpush.msrb.mxu0 %v408_v60 }
  0xb4   : > { %670 = vmatpush.msrb.mxu2 %v456_v61  ;;  %826 = vmatpush.msra.mxu3 %v404_v62 }
  0xb5   : > { %644 = vmatpush.msrb.mxu0 %v404_v62  ;;  %806 = vmatmul.msk.f32.gmra.mxu3 %vm489_vm0, %v1237_v41 }
  0xb6   : > { %671 = vmatpush.msrb.mxu2 %v452_v63  ;;  %827 = vmatpush.msra.mxu3 %v400_v0 }
  0xb7   : > { %645 = vmatpush.msrb.mxu0 %v400_v0 }
  0xb8   : > { %672 = vmatpush.msrb.mxu2 %v448_v1  ;;  %828 = vmatpush.msra.mxu3 %v396_v2 }
  0xb9   : > { %646 = vmatpush.msrb.mxu0 %v396_v2  ;;  %807 = vmatmul.msk.f32.vlgmr.msrb.gmra.mxu2 %vm489_vm0, %v1210_v27 }
  0xba   : > { %486 = vperm.xlu0 %859, %v478_v3   ;;  %829 = vmatpush.msra.mxu3 %v392_v4 }
  0xbb   : > { %607 = vmatmul.f32.gmra.mxu1 %v1244_v44  ;;  %647 = vmatpush.msrb.mxu0 %v392_v4 }
  0xbc   : > { %830 = vmatpush.msra.mxu3 %v388_v5 }
  0xbd   : > { %648 = vmatpush.msrb.mxu0 %v388_v5 }
  0xbe   : > { %831 = vmatpush.msra.mxu3 %v384_v6 }
  0xbf   : > { %649 = vmatpush.msrb.mxu0 %v384_v6  ;;  %653 = vmatmul.f32.vlgmr.msra.gmra.mxu3 %v1244_v44 }
  0xc0   : > { %650 = vmatmul.f32.vlgmr.msrb.gmra.mxu0 %v1222_v33 }
  0xc1   : > { %808 = vmatmul.msk.f32.gmra.mxu2 %vm489_vm0, %v1237_v41 }
 0x11d   : > { %v536_v7 = vpop.f32.mrf.mxu1 }
 0x11e   : > { %v582_v8 = vpop.f32.mrf.mxu3 }
 0x11f   : > { %v513_v12 = vpop.f32.mrf.mxu0 }
 0x120   : > { %v559_v9 = vpop.f32.mrf.mxu2 }
 0x123   : > { %v482_v10 = vpop.permute.xlu0 %481 }
 0x124   : > { %v560_v11 = vadd.f32 %v559_v9, %v482_v10  ;;  %v514_v14 = vadd.f32 %v513_v12, %v482_v10 }
 0x126   : > { %v583_v13 = vadd.f32 %v582_v8, %v560_v11  ;;  %v539_v15 = vpop.f32.mrf.mxu1  ;;  %v537_v18 = vadd.f32 %v536_v7, %v514_v14 }
 0x128   : > { %v585_v16 = vpop.f32.mrf.mxu3  ;;  %v681_v17 = vmax.f32 %v583_v13, 0.0  ;;  %v680_v19 = vmax.f32 %v537_v18, 0.0 }
 0x12a   : > { %689 = vst [vmem:[%s1296_s24 + $0x8] sm:$0xff] %v681_v17  ;;  %v562_v20 = vpop.f32.mrf.mxu2 }
 0x12b   : > { %688 = vst [vmem:[%s1296_s24] sm:$0xff] %v680_v19 }
 0x12c   : > { %v487_v21 = vpop.permute.xlu0 %486 }
 0x12d   : > { %v563_v22 = vadd.f32 %v562_v20, %v487_v21 }
 0x12f   : > { %v586_v23 = vadd.f32 %v585_v16, %v563_v22  ;;  %v516_v24 = vpop.f32.mrf.mxu0 }
 0x130   : > { %v517_v25 = vadd.f32 %v516_v24, %v487_v21  ;;  %v605_v26 = vpop.f32.mrf.mxu1  ;;  %v628_v27 = vpop.f32.mrf.mxu3 }
 0x131   : > { %v685_v28 = vmax.f32 %v586_v23, 0.0  ;;  %v606_v29 = vadd.f32 %v605_v26, %v482_v10  ;;  %v720_v50 = vld [vmem:[%s1296_s24 + $0x8] sm:$0xff] (%p935_p5) }
 0x132   : > { %v540_v30 = vadd.f32 %v539_v15, %v517_v25  ;;  %v718_v49 = vld [vmem:[%s1296_s24] sm:$0xff] (%p935_p5)  ;;  %721 = vst [vmem:[%s705_s27 + $0x8] sm:$0xff] (%p935_p5), %v720_v50 }
 0x133   : > { %693 = vst [vmem:[%s1296_s24 + $0x28] sm:$0xff] %v685_v28  ;;  %v629_v31 = vadd.f32 %v628_v27, %v606_v29 }
 0x134   : > { %v684_v32 = vmax.f32 %v540_v30, 0.0  ;;  %719 = vst [vmem:[%s705_s27] sm:$0xff] (%p935_p5), %v718_v49 }
 0x135   : > { %v682_v33 = vmax.f32 %v629_v31, 0.0 }
 0x136   : > { %692 = vst [vmem:[%s1296_s24 + $0x20] sm:$0xff] %v684_v32 }
 0x137   : > { %690 = vst [vmem:[%s1296_s24 + $0x10] sm:$0xff] %v682_v33 }
 0x138   : > { %v608_v34 = vpop.f32.mrf.mxu1  ;;  %v631_v35 = vpop.f32.mrf.mxu3 }
 0x139   : > { %v609_v36 = vadd.f32 %v608_v34, %v487_v21 }
 0x13a   : > { %v728_v54 = vld [vmem:[%s1296_s24 + $0x28] sm:$0xff] (%p935_p5) }
 0x13b   : > { %v632_v37 = vadd.f32 %v631_v35, %v609_v36  ;;  %729 = vst [vmem:[%s705_s27 + $0x88] sm:$0xff] (%p935_p5), %v728_v54 }
 0x13c   : > { %v674_v38 = vpop.f32.mrf.mxu2 }
 0x13d   : > { %v686_v39 = vmax.f32 %v632_v37, 0.0  ;;  %v651_v40 = vpop.f32.mrf.mxu0  ;;  %v726_v53 = vld [vmem:[%s1296_s24 + $0x20] sm:$0xff] (%p935_p5) }
 0x13e   : > { %v652_v41 = vadd.f32 %v651_v40, %v482_v10  ;;  %v722_v51 = vld [vmem:[%s1296_s24 + $0x10] sm:$0xff] (%p935_p5)  ;;  %727 = vst [vmem:[%s705_s27 + $0x80] sm:$0xff] (%p935_p5), %v726_v53 }
 0x13f   : > { %694 = vst [vmem:[%s1296_s24 + $0x30] sm:$0xff] %v686_v39 }
 0x140   : > { %v675_v42 = vadd.f32 %v674_v38, %v652_v41  ;;  %723 = vst [vmem:[%s705_s27 + $0x10] sm:$0xff] (%p935_p5), %v722_v51 }
 0x142   : > { %v683_v43 = vmax.f32 %v675_v42, 0.0  ;;  %v654_v44 = vpop.f32.mrf.mxu3 }
 0x143   : > { %v655_v45 = vadd.f32 %v654_v44, %v487_v21 }
 0x144   : > { %691 = vst [vmem:[%s1296_s24 + $0x18] sm:$0xff] %v683_v43  ;;  %v677_v46 = vpop.f32.mrf.mxu2 }
 0x145   : > { %v678_v47 = vadd.f32 %v677_v46, %v655_v45  ;;  %702 = sbr.rel (!%p935_p5) target bundleno = 338 (0x152), region = 59 }
 0x146   : > { %v730_v55 = vld [vmem:[%s1296_s24 + $0x30] sm:$0xff] (%p935_p5) }
 0x147   : > { %v687_v48 = vmax.f32 %v678_v47, 0.0  ;;  %731 = vst [vmem:[%s705_s27 + $0x90] sm:$0xff] (%p935_p5), %v730_v55 }
 0x149   : > { %695 = vst [vmem:[%s1296_s24 + $0x38] sm:$0xff] %v687_v48 }
 0x14b   : > { %v724_v52 = vld [vmem:[%s1296_s24 + $0x18] sm:$0xff] }
 0x14c   : > { %725 = vst [vmem:[%s705_s27 + $0x18] sm:$0xff] %v724_v52 }
 0x150   : > { %v732_v56 = vld [vmem:[%s1296_s24 + $0x38] sm:$0xff] }
 0x151   : > { %733 = vst [vmem:[%s705_s27 + $0x98] sm:$0xff] %v732_v56 }
 0x152 PF: > { %p10_p10 = scmp.ge.s32.totalorder %s922_s16, 6   ;;  %s1336_s12 = smov %s878_s13 }
 0x153   : > { %s1337_s13 = smov %s933_s19  ;;  %s1338_s14 = smov %s922_s16 }
 0x154   :  { %12 = sbr.rel (!%p10_p10) target bundleno = 2 (0x2), region = 113 }

// kernel: fe_forward.6
= control target key start
LH: loop header
LB: loop body
LE: loop exit
PB: predicated region body
PF: predicated region fallthrough
CT: control target
= control target key end

     0   :  { %s978_s2 = inlined_call_operand.vmem [shape: f32[256,512], index: 2, kind: input, shape index: {}]   ;;  %s979_s0 = inlined_call_operand.vmem [shape: f32[32,256], index: 0, kind: input, shape index: {}]   ;;  %s980_s1 = inlined_call_operand.vmem [shape: f32[32,1], index: 1, kind: input, shape index: {}]   ;;  %s981_s3 = inlined_call_operand.vmem [shape: f32[32,512], index: 3, kind: output, shape index: {}]  }
   0x1   :  { %v82_v0 = vld [vmem:[%s978_s2 + $0x1e0] sm:$0xff]  ;;  %v83_v1 = vld [vmem:[%s978_s2 + $0x1e8] sm:$0xff]  ;;  %v85_v63 = vld [vmem:[%s978_s2 + $0x1f8] sm:$0xff] }
   0x2   :  { %v78_v2 = vld [vmem:[%s978_s2 + $0x1c0] sm:$0xff]  ;;  %174 = vmatpush.msra.mxu0 %v82_v0  ;;  %232 = vmatpush.msra.mxu2 %v83_v1  ;;  %v79_v4 = vld [vmem:[%s978_s2 + $0x1c8] sm:$0xff] }
   0x3   :  { %v146_v3 = vld [vmem:[%s978_s2 + $0x3e0] sm:$0xff]  ;;  %v147_v5 = vld [vmem:[%s978_s2 + $0x3e8] sm:$0xff] }
   0x4   :  { %203 = vmatpush.msra.mxu1 %v146_v3  ;;  %261 = vmatpush.msra.mxu3 %v147_v5  ;;  %v74_v6 = vld [vmem:[%s978_s2 + $0x1a0] sm:$0xff]  ;;  %v75_v8 = vld [vmem:[%s978_s2 + $0x1a8] sm:$0xff]  ;;  %v149_v5 = vld [vmem:[%s978_s2 + $0x3f8] sm:$0xff] }
   0x5   :  { %v142_v7 = vld [vmem:[%s978_s2 + $0x3c0] sm:$0xff]  ;;  %175 = vmatpush.msra.mxu0 %v78_v2  ;;  %233 = vmatpush.msra.mxu2 %v79_v4  ;;  %v143_v9 = vld [vmem:[%s978_s2 + $0x3c8] sm:$0xff]  ;;  %v84_v2 = vld [vmem:[%s978_s2 + $0x1f0] sm:$0xff] }
   0x6   :  { %v138_v10 = vld [vmem:[%s978_s2 + $0x3a0] sm:$0xff]  ;;  %204 = vmatpush.msra.mxu1 %v142_v7  ;;  %262 = vmatpush.msra.mxu3 %v143_v9  ;;  %v71_v12 = vld [vmem:[%s978_s2 + $0x188] sm:$0xff]  ;;  %v81_v4 = vld [vmem:[%s978_s2 + $0x1d8] sm:$0xff] }
   0x7   :  { %v70_v11 = vld [vmem:[%s978_s2 + $0x180] sm:$0xff]  ;;  %v139_v13 = vld [vmem:[%s978_s2 + $0x3a8] sm:$0xff]  ;;  %176 = vmatpush.msra.mxu0 %v74_v6  ;;  %234 = vmatpush.msra.mxu2 %v75_v8  ;;  %v80_v6 = vld [vmem:[%s978_s2 + $0x1d0] sm:$0xff] }
   0x8   :  { %v134_v14 = vld [vmem:[%s978_s2 + $0x380] sm:$0xff]  ;;  %v135_v15 = vld [vmem:[%s978_s2 + $0x388] sm:$0xff]  ;;  %205 = vmatpush.msra.mxu1 %v138_v10  ;;  %263 = vmatpush.msra.mxu3 %v139_v13  ;;  %v148_v7 = vld [vmem:[%s978_s2 + $0x3f0] sm:$0xff] }
   0x9   :  { %v66_v16 = vld [vmem:[%s978_s2 + $0x160] sm:$0xff]  ;;  %v67_v17 = vld [vmem:[%s978_s2 + $0x168] sm:$0xff]  ;;  %177 = vmatpush.msra.mxu0 %v70_v11  ;;  %235 = vmatpush.msra.mxu2 %v71_v12  ;;  %v77_v8 = vld [vmem:[%s978_s2 + $0x1b8] sm:$0xff] }
   0xa   :  { %v130_v18 = vld [vmem:[%s978_s2 + $0x360] sm:$0xff]  ;;  %v131_v19 = vld [vmem:[%s978_s2 + $0x368] sm:$0xff]  ;;  %206 = vmatpush.msra.mxu1 %v134_v14  ;;  %264 = vmatpush.msra.mxu3 %v135_v15  ;;  %v145_v9 = vld [vmem:[%s978_s2 + $0x3d8] sm:$0xff] }
   0xb   :  { %v62_v20 = vld [vmem:[%s978_s2 + $0x140] sm:$0xff]  ;;  %v63_v21 = vld [vmem:[%s978_s2 + $0x148] sm:$0xff]  ;;  %178 = vmatpush.msra.mxu0 %v66_v16  ;;  %236 = vmatpush.msra.mxu2 %v67_v17  ;;  %v76_v10 = vld [vmem:[%s978_s2 + $0x1b0] sm:$0xff] }
   0xc   :  { %v126_v22 = vld [vmem:[%s978_s2 + $0x340] sm:$0xff]  ;;  %v127_v23 = vld [vmem:[%s978_s2 + $0x348] sm:$0xff]  ;;  %207 = vmatpush.msra.mxu1 %v130_v18  ;;  %265 = vmatpush.msra.mxu3 %v131_v19  ;;  %v144_v11 = vld [vmem:[%s978_s2 + $0x3d0] sm:$0xff] }
   0xd   :  { %v58_v24 = vld [vmem:[%s978_s2 + $0x120] sm:$0xff]  ;;  %v59_v25 = vld [vmem:[%s978_s2 + $0x128] sm:$0xff]  ;;  %179 = vmatpush.msra.mxu0 %v62_v20  ;;  %237 = vmatpush.msra.mxu2 %v63_v21  ;;  %v73_v12 = vld [vmem:[%s978_s2 + $0x198] sm:$0xff] }
   0xe   :  { %v122_v26 = vld [vmem:[%s978_s2 + $0x320] sm:$0xff]  ;;  %v123_v27 = vld [vmem:[%s978_s2 + $0x328] sm:$0xff]  ;;  %208 = vmatpush.msra.mxu1 %v126_v22  ;;  %266 = vmatpush.msra.mxu3 %v127_v23  ;;  %v141_v13 = vld [vmem:[%s978_s2 + $0x3b8] sm:$0xff] }
   0xf   :  { %v54_v28 = vld [vmem:[%s978_s2 + $0x100] sm:$0xff]  ;;  %v55_v29 = vld [vmem:[%s978_s2 + $0x108] sm:$0xff]  ;;  %180 = vmatpush.msra.mxu0 %v58_v24  ;;  %238 = vmatpush.msra.mxu2 %v59_v25  ;;  %v72_v14 = vld [vmem:[%s978_s2 + $0x190] sm:$0xff] }
  0x10   :  { %v118_v30 = vld [vmem:[%s978_s2 + $0x300] sm:$0xff]  ;;  %v119_v31 = vld [vmem:[%s978_s2 + $0x308] sm:$0xff]  ;;  %209 = vmatpush.msra.mxu1 %v122_v26  ;;  %267 = vmatpush.msra.mxu3 %v123_v27  ;;  %v140_v15 = vld [vmem:[%s978_s2 + $0x3b0] sm:$0xff] }
  0x11   :  { %v50_v32 = vld [vmem:[%s978_s2 + $0xe0] sm:$0xff]  ;;  %v51_v33 = vld [vmem:[%s978_s2 + $0xe8] sm:$0xff]  ;;  %181 = vmatpush.msra.mxu0 %v54_v28  ;;  %239 = vmatpush.msra.mxu2 %v55_v29  ;;  %v717_v16 = vld [vmem:[%s979_s0 + $0x10] sm:$0xff] }
  0x12   :  { %v114_v34 = vld [vmem:[%s978_s2 + $0x2e0] sm:$0xff]  ;;  %v115_v35 = vld [vmem:[%s978_s2 + $0x2e8] sm:$0xff]  ;;  %210 = vmatpush.msra.mxu1 %v118_v30  ;;  %268 = vmatpush.msra.mxu3 %v119_v31  ;;  %v69_v17 = vld [vmem:[%s978_s2 + $0x178] sm:$0xff] }
  0x13   :  { %v46_v36 = vld [vmem:[%s978_s2 + $0xc0] sm:$0xff]  ;;  %v47_v37 = vld [vmem:[%s978_s2 + $0xc8] sm:$0xff]  ;;  %182 = vmatpush.msra.mxu0 %v50_v32  ;;  %240 = vmatpush.msra.mxu2 %v51_v33  ;;  %v137_v18 = vld [vmem:[%s978_s2 + $0x398] sm:$0xff] }
  0x14   :  { %v110_v38 = vld [vmem:[%s978_s2 + $0x2c0] sm:$0xff]  ;;  %v111_v39 = vld [vmem:[%s978_s2 + $0x2c8] sm:$0xff]  ;;  %211 = vmatpush.msra.mxu1 %v114_v34  ;;  %269 = vmatpush.msra.mxu3 %v115_v35  ;;  %v68_v19 = vld [vmem:[%s978_s2 + $0x170] sm:$0xff] }
  0x15   :  { %v42_v40 = vld [vmem:[%s978_s2 + $0xa0] sm:$0xff]  ;;  %v43_v41 = vld [vmem:[%s978_s2 + $0xa8] sm:$0xff]  ;;  %183 = vmatpush.msra.mxu0 %v46_v36  ;;  %241 = vmatpush.msra.mxu2 %v47_v37  ;;  %v136_v20 = vld [vmem:[%s978_s2 + $0x390] sm:$0xff] }
  0x16   :  { %v106_v42 = vld [vmem:[%s978_s2 + $0x2a0] sm:$0xff]  ;;  %v107_v43 = vld [vmem:[%s978_s2 + $0x2a8] sm:$0xff]  ;;  %212 = vmatpush.msra.mxu1 %v110_v38  ;;  %270 = vmatpush.msra.mxu3 %v111_v39  ;;  %v736_v21 = vld [vmem:[%s979_s0 + $0x18] sm:$0xff]  ;;  %v445_v38 = vmov 0  }
  0x17   :  { %v38_v44 = vld [vmem:[%s978_s2 + $0x80] sm:$0xff]  ;;  %v39_v45 = vld [vmem:[%s978_s2 + $0x88] sm:$0xff]  ;;  %184 = vmatpush.msra.mxu0 %v42_v40  ;;  %242 = vmatpush.msra.mxu2 %v43_v41  ;;  %v65_v22 = vld [vmem:[%s978_s2 + $0x158] sm:$0xff] }
  0x18   :  { %v102_v46 = vld [vmem:[%s978_s2 + $0x280] sm:$0xff]  ;;  %v103_v47 = vld [vmem:[%s978_s2 + $0x288] sm:$0xff]  ;;  %213 = vmatpush.msra.mxu1 %v106_v42  ;;  %271 = vmatpush.msra.mxu3 %v107_v43  ;;  %v133_v23 = vld [vmem:[%s978_s2 + $0x378] sm:$0xff] }
  0x19   :  { %v34_v48 = vld [vmem:[%s978_s2 + $0x60] sm:$0xff]  ;;  %v35_v49 = vld [vmem:[%s978_s2 + $0x68] sm:$0xff]  ;;  %185 = vmatpush.msra.mxu0 %v38_v44  ;;  %243 = vmatpush.msra.mxu2 %v39_v45  ;;  %v64_v24 = vld [vmem:[%s978_s2 + $0x150] sm:$0xff] }
  0x1a   :  { %v98_v50 = vld [vmem:[%s978_s2 + $0x260] sm:$0xff]  ;;  %v99_v51 = vld [vmem:[%s978_s2 + $0x268] sm:$0xff]  ;;  %214 = vmatpush.msra.mxu1 %v102_v46  ;;  %272 = vmatpush.msra.mxu3 %v103_v47  ;;  %v132_v25 = vld [vmem:[%s978_s2 + $0x370] sm:$0xff] }
  0x1b   :  { %v30_v52 = vld [vmem:[%s978_s2 + $0x40] sm:$0xff]  ;;  %v31_v53 = vld [vmem:[%s978_s2 + $0x48] sm:$0xff]  ;;  %186 = vmatpush.msra.mxu0 %v34_v48  ;;  %244 = vmatpush.msra.mxu2 %v35_v49  ;;  %v61_v26 = vld [vmem:[%s978_s2 + $0x138] sm:$0xff] }
  0x1c   :  { %v94_v54 = vld [vmem:[%s978_s2 + $0x240] sm:$0xff]  ;;  %v95_v55 = vld [vmem:[%s978_s2 + $0x248] sm:$0xff]  ;;  %215 = vmatpush.msra.mxu1 %v98_v50  ;;  %273 = vmatpush.msra.mxu3 %v99_v51  ;;  %v129_v27 = vld [vmem:[%s978_s2 + $0x358] sm:$0xff] }
  0x1d   :  { %v26_v56 = vld [vmem:[%s978_s2 + $0x20] sm:$0xff]  ;;  %v27_v57 = vld [vmem:[%s978_s2 + $0x28] sm:$0xff]  ;;  %187 = vmatpush.msra.mxu0 %v30_v52  ;;  %245 = vmatpush.msra.mxu2 %v31_v53  ;;  %v60_v28 = vld [vmem:[%s978_s2 + $0x130] sm:$0xff] }
  0x1e   :  { %v90_v58 = vld [vmem:[%s978_s2 + $0x220] sm:$0xff]  ;;  %v91_v59 = vld [vmem:[%s978_s2 + $0x228] sm:$0xff]  ;;  %216 = vmatpush.msra.mxu1 %v94_v54  ;;  %274 = vmatpush.msra.mxu3 %v95_v55  ;;  %v128_v29 = vld [vmem:[%s978_s2 + $0x350] sm:$0xff] }
  0x1f   :  { %v22_v60 = vld [vmem:[%s978_s2] sm:$0xff]  ;;  %v23_v61 = vld [vmem:[%s978_s2 + $0x8] sm:$0xff]  ;;  %188 = vmatpush.msra.mxu0 %v26_v56  ;;  %246 = vmatpush.msra.mxu2 %v27_v57  ;;  %v57_v30 = vld [vmem:[%s978_s2 + $0x118] sm:$0xff] }
  0x20   :  { %v655_v62 = vld [vmem:[%s979_s0] sm:$0xff]  ;;  %217 = vmatpush.msra.mxu1 %v90_v58  ;;  %275 = vmatpush.msra.mxu3 %v91_v59  ;;  %v87_v1 = vld [vmem:[%s978_s2 + $0x208] sm:$0xff]  ;;  %v125_v31 = vld [vmem:[%s978_s2 + $0x338] sm:$0xff] }
  0x21   :  { %v86_v0 = vld [vmem:[%s978_s2 + $0x200] sm:$0xff]  ;;  %189 = vmatpush.msra.mxu0 %v22_v60  ;;  %247 = vmatpush.msra.mxu2 %v23_v61  ;;  %v674_v3 = vld [vmem:[%s979_s0 + $0x8] sm:$0xff]  ;;  %v56_v32 = vld [vmem:[%s978_s2 + $0x110] sm:$0xff] }
  0x22   :  { %190 = vmatmul.f32.vlgmr.msra.gmra.mxu0 %v655_v62  ;;  %248 = vmatmul.f32.vlgmr.msra.gmra.mxu2 %v655_v62  ;;  %v124_v33 = vld [vmem:[%s978_s2 + $0x330] sm:$0xff]  ;;  %v779_v34 = vld [vmem:[%s979_s0 + $0x20] sm:$0xff]  ;;  %v121_v35 = vld [vmem:[%s978_s2 + $0x318] sm:$0xff] }
  0x23   :  { %348 = vmatpush.msrb.mxu2 %v85_v63  ;;  %218 = vmatpush.msra.mxu1 %v86_v0  ;;  %v53_v36 = vld [vmem:[%s978_s2 + $0xf8] sm:$0xff]  ;;  %v52_v37 = vld [vmem:[%s978_s2 + $0xf0] sm:$0xff]  ;;  %v150_v40 = vld [vmem:[%s980_s1] sm:$0xff] }
  0x24   :  { %276 = vmatpush.msra.mxu3 %v87_v1  ;;  %290 = vmatpush.msrb.mxu0 %v84_v2  ;;  %v120_v39 = vld [vmem:[%s978_s2 + $0x310] sm:$0xff]  ;;  %v802_v41 = vld [vmem:[%s979_s0 + $0x28] sm:$0xff]  ;;  %v49_v42 = vld [vmem:[%s978_s2 + $0xd8] sm:$0xff] }
  0x25   :  { %219 = vmatmul.f32.vlgmr.msra.gmra.mxu1 %v674_v3  ;;  %277 = vmatmul.f32.vlgmr.msra.gmra.mxu3 %v674_v3  ;;  %v117_v43 = vld [vmem:[%s978_s2 + $0x2f8] sm:$0xff]  ;;  %v48_v44 = vld [vmem:[%s978_s2 + $0xd0] sm:$0xff]  ;;  %v151_v59 = vld [vmem:[%s980_s1 + $0x8] sm:$0xff] }
  0x26   :  { %349 = vmatpush.msrb.mxu2 %v81_v4  ;;  %377 = vmatpush.msrb.mxu3 %v149_v5  ;;  %v116_v45 = vld [vmem:[%s978_s2 + $0x2f0] sm:$0xff]  ;;  %v45_v46 = vld [vmem:[%s978_s2 + $0xb8] sm:$0xff] }
  0x27   :  { %291 = vmatpush.msrb.mxu0 %v80_v6  ;;  %319 = vmatpush.msrb.mxu1 %v148_v7  ;;  %v113_v47 = vld [vmem:[%s978_s2 + $0x2d8] sm:$0xff]  ;;  %v44_v48 = vld [vmem:[%s978_s2 + $0xb0] sm:$0xff] }
  0x28   :  { %350 = vmatpush.msrb.mxu2 %v77_v8  ;;  %378 = vmatpush.msrb.mxu3 %v145_v9  ;;  %v112_v49 = vld [vmem:[%s978_s2 + $0x2d0] sm:$0xff]  ;;  %v41_v50 = vld [vmem:[%s978_s2 + $0x98] sm:$0xff] }
  0x29   :  { %292 = vmatpush.msrb.mxu0 %v76_v10  ;;  %320 = vmatpush.msrb.mxu1 %v144_v11  ;;  %v109_v51 = vld [vmem:[%s978_s2 + $0x2b8] sm:$0xff]  ;;  %v40_v52 = vld [vmem:[%s978_s2 + $0x90] sm:$0xff] }
  0x2a   :  { %351 = vmatpush.msrb.mxu2 %v73_v12  ;;  %379 = vmatpush.msrb.mxu3 %v141_v13  ;;  %v108_v53 = vld [vmem:[%s978_s2 + $0x2b0] sm:$0xff]  ;;  %v37_v55 = vld [vmem:[%s978_s2 + $0x78] sm:$0xff] }
  0x2b   :  { %293 = vmatpush.msrb.mxu0 %v72_v14  ;;  %321 = vmatpush.msrb.mxu1 %v140_v15  ;;  %v845_v54 = vld [vmem:[%s979_s0 + $0x30] sm:$0xff]  ;;  %v105_v56 = vld [vmem:[%s978_s2 + $0x298] sm:$0xff] }
  0x2c   :  { %193 = vmatmul.f32.gmra.mxu0 %v717_v16  ;;  %251 = vmatmul.f32.gmra.mxu2 %v717_v16  ;;  %v36_v57 = vld [vmem:[%s978_s2 + $0x70] sm:$0xff]  ;;  %v21_v60 = vld [vmem:[%s979_s0 + $0x38] sm:$0xff] }
  0x2d   :  { %352 = vmatpush.msrb.mxu2 %v69_v17  ;;  %380 = vmatpush.msrb.mxu3 %v137_v18  ;;  %v104_v58 = vld [vmem:[%s978_s2 + $0x290] sm:$0xff]  ;;  %v33_v61 = vld [vmem:[%s978_s2 + $0x58] sm:$0xff] }
  0x2e   :  { %294 = vmatpush.msrb.mxu0 %v68_v19  ;;  %322 = vmatpush.msrb.mxu1 %v136_v20  ;;  %v101_v63 = vld [vmem:[%s978_s2 + $0x278] sm:$0xff]  ;;  %v32_v0 = vld [vmem:[%s978_s2 + $0x50] sm:$0xff] }
  0x2f   :  { %222 = vmatmul.f32.gmra.mxu1 %v736_v21  ;;  %280 = vmatmul.f32.gmra.mxu3 %v736_v21  ;;  %v100_v1 = vld [vmem:[%s978_s2 + $0x270] sm:$0xff]  ;;  %v29_v2 = vld [vmem:[%s978_s2 + $0x38] sm:$0xff] }
  0x30   :  { %353 = vmatpush.msrb.mxu2 %v65_v22  ;;  %381 = vmatpush.msrb.mxu3 %v133_v23  ;;  %v97_v4 = vld [vmem:[%s978_s2 + $0x258] sm:$0xff]  ;;  %v28_v5 = vld [vmem:[%s978_s2 + $0x30] sm:$0xff] }
  0x31   :  { %295 = vmatpush.msrb.mxu0 %v64_v24  ;;  %323 = vmatpush.msrb.mxu1 %v132_v25  ;;  %v96_v6 = vld [vmem:[%s978_s2 + $0x250] sm:$0xff]  ;;  %v25_v7 = vld [vmem:[%s978_s2 + $0x18] sm:$0xff] }
  0x32   :  { %354 = vmatpush.msrb.mxu2 %v61_v26  ;;  %382 = vmatpush.msrb.mxu3 %v129_v27  ;;  %v93_v8 = vld [vmem:[%s978_s2 + $0x238] sm:$0xff]  ;;  %v24_v9 = vld [vmem:[%s978_s2 + $0x10] sm:$0xff] }
  0x33   :  { %296 = vmatpush.msrb.mxu0 %v60_v28  ;;  %324 = vmatpush.msrb.mxu1 %v128_v29  ;;  %v92_v10 = vld [vmem:[%s978_s2 + $0x230] sm:$0xff]  ;;  %v89_v11 = vld [vmem:[%s978_s2 + $0x218] sm:$0xff] }
  0x34   :  { %355 = vmatpush.msrb.mxu2 %v57_v30  ;;  %383 = vmatpush.msrb.mxu3 %v125_v31  ;;  %v88_v12 = vld [vmem:[%s978_s2 + $0x210] sm:$0xff]  ;;  %v153_v14 = vld [vmem:[%s980_s1 + $0x18] sm:$0xff] }
  0x35   :  { %297 = vmatpush.msrb.mxu0 %v56_v32  ;;  %325 = vmatpush.msrb.mxu1 %v124_v33  ;;  %v152_v13 = vld [vmem:[%s980_s1 + $0x10] sm:$0xff] }
  0x36   :  { %443 = vset.pattern.permute.xlu0 %v445_v38  ;;  %196 = vmatmul.f32.gmra.mxu0 %v779_v34 }
  0x37   :  { %254 = vmatmul.f32.gmra.mxu2 %v779_v34  ;;  %384 = vmatpush.msrb.mxu3 %v121_v35 }
  0x38   :  { %356 = vmatpush.msrb.mxu2 %v53_v36  ;;  %298 = vmatpush.msrb.mxu0 %v52_v37 }
  0x39   :  { %326 = vmatpush.msrb.mxu1 %v120_v39  ;;  %156 = vperm.xlu0 %443, %v150_v40  }
  0x3a   :  { %225 = vmatmul.f32.gmra.mxu1 %v802_v41  ;;  %283 = vmatmul.f32.gmra.mxu3 %v802_v41 }
  0x3b   :  { %357 = vmatpush.msrb.mxu2 %v49_v42  ;;  %385 = vmatpush.msrb.mxu3 %v117_v43 }
  0x3c   :  { %299 = vmatpush.msrb.mxu0 %v48_v44  ;;  %327 = vmatpush.msrb.mxu1 %v116_v45 }
  0x3d   :  { %358 = vmatpush.msrb.mxu2 %v45_v46  ;;  %386 = vmatpush.msrb.mxu3 %v113_v47 }
  0x3e   :  { %300 = vmatpush.msrb.mxu0 %v44_v48  ;;  %328 = vmatpush.msrb.mxu1 %v112_v49 }
  0x3f   :  { %359 = vmatpush.msrb.mxu2 %v41_v50  ;;  %387 = vmatpush.msrb.mxu3 %v109_v51 }
  0x40   :  { %301 = vmatpush.msrb.mxu0 %v40_v52  ;;  %329 = vmatpush.msrb.mxu1 %v108_v53 }
  0x41   :  { %199 = vmatmul.f32.gmra.mxu0 %v845_v54  ;;  %257 = vmatmul.f32.gmra.mxu2 %v845_v54 }
  0x42   :  { %360 = vmatpush.msrb.mxu2 %v37_v55  ;;  %388 = vmatpush.msrb.mxu3 %v105_v56 }
  0x43   :  { %302 = vmatpush.msrb.mxu0 %v36_v57  ;;  %330 = vmatpush.msrb.mxu1 %v104_v58 }
  0x44   :  { %161 = vperm.xlu0 %443, %v151_v59   ;;  %228 = vmatmul.f32.gmra.mxu1 %v21_v60 }
  0x45   :  { %286 = vmatmul.f32.gmra.mxu3 %v21_v60  ;;  %361 = vmatpush.msrb.mxu2 %v33_v61 }
  0x46   :  { %389 = vmatpush.msrb.mxu3 %v101_v63  ;;  %303 = vmatpush.msrb.mxu0 %v32_v0 }
  0x47   :  { %331 = vmatpush.msrb.mxu1 %v100_v1  ;;  %362 = vmatpush.msrb.mxu2 %v29_v2 }
  0x48   :  { %390 = vmatpush.msrb.mxu3 %v97_v4  ;;  %304 = vmatpush.msrb.mxu0 %v28_v5 }
  0x49   :  { %332 = vmatpush.msrb.mxu1 %v96_v6  ;;  %363 = vmatpush.msrb.mxu2 %v25_v7 }
  0x4a   :  { %391 = vmatpush.msrb.mxu3 %v93_v8  ;;  %305 = vmatpush.msrb.mxu0 %v24_v9 }
  0x4b   :  { %333 = vmatpush.msrb.mxu1 %v92_v10  ;;  %444 = vset.pattern.permute.xlu1 %v445_v38 }
  0x4c   :  { %306 = vmatmul.f32.vlgmr.msrb.gmra.mxu0 %v655_v62  ;;  %364 = vmatmul.f32.vlgmr.msrb.gmra.mxu2 %v655_v62 }
  0x4d   :  { %392 = vmatpush.msrb.mxu3 %v89_v11  ;;  %334 = vmatpush.msrb.mxu1 %v88_v12 }
  0x4e   :  { %166 = vperm.xlu1 %444, %v152_v13   ;;  %335 = vmatmul.f32.vlgmr.msrb.gmra.mxu1 %v674_v3 }
  0x4f   :  { %393 = vmatmul.f32.vlgmr.msrb.gmra.mxu3 %v674_v3 }
  0x54   :  { %309 = vmatmul.f32.gmra.mxu0 %v717_v16  ;;  %367 = vmatmul.f32.gmra.mxu2 %v717_v16 }
  0x56   :  { %171 = vperm.xlu1 %444, %v153_v14   ;;  %338 = vmatmul.f32.gmra.mxu1 %v736_v21 }
  0x57   :  { %396 = vmatmul.f32.gmra.mxu3 %v736_v21 }
  0x5c   :  { %312 = vmatmul.f32.gmra.mxu0 %v779_v34  ;;  %370 = vmatmul.f32.gmra.mxu2 %v779_v34 }
  0x5e   :  { %341 = vmatmul.f32.gmra.mxu1 %v802_v41 }
  0x5f   :  { %399 = vmatmul.f32.gmra.mxu3 %v802_v41 }
  0x64   :  { %315 = vmatmul.f32.gmra.mxu0 %v845_v54  ;;  %373 = vmatmul.f32.gmra.mxu2 %v845_v54 }
  0x66   :  { %344 = vmatmul.f32.gmra.mxu1 %v21_v60 }
  0x67   :  { %402 = vmatmul.f32.gmra.mxu3 %v21_v60 }
  0x9f   :  { %v191_v62 = vpop.f32.mrf.mxu0 }
  0xa2   :  { %v220_v3 = vpop.f32.mrf.mxu1 }
  0xa5   :  { %v249_v15 = vpop.f32.mrf.mxu2 }
  0xa8   :  { %v278_v16 = vpop.f32.mrf.mxu3 }
  0xa9   :  { %v194_v18 = vpop.f32.mrf.mxu0 }
  0xab   :  { %v157_v17 = vpop.permute.xlu0 %156 }
  0xac   :  { %v192_v19 = vadd.f32 %v191_v62, %v157_v17  ;;  %v250_v20 = vadd.f32 %v249_v15, %v157_v17  ;;  %v223_v21 = vpop.f32.mrf.mxu1 }
  0xae   :  { %v221_v22 = vadd.f32 %v220_v3, %v192_v19  ;;  %v279_v23 = vadd.f32 %v278_v16, %v250_v20 }
  0xaf   :  { %v252_v26 = vpop.f32.mrf.mxu2 }
  0xb0   :  { %v406_v24 = vmax.f32 %v221_v22, 0.0  ;;  %v407_v25 = vmax.f32 %v279_v23, 0.0 }
  0xb2   :  { %422 = vst [vmem:[%s981_s3] sm:$0xff] %v406_v24  ;;  %v281_v27 = vpop.f32.mrf.mxu3 }
  0xb3   :  { %423 = vst [vmem:[%s981_s3 + $0x8] sm:$0xff] %v407_v25  ;;  %v197_v28 = vpop.f32.mrf.mxu0 }
  0xb6   :  { %v162_v29 = vpop.permute.xlu0 %161 }
  0xb7   :  { %v195_v30 = vadd.f32 %v194_v18, %v162_v29  ;;  %v253_v31 = vadd.f32 %v252_v26, %v162_v29  ;;  %v226_v32 = vpop.f32.mrf.mxu1 }
  0xb9   :  { %v224_v33 = vadd.f32 %v223_v21, %v195_v30  ;;  %v282_v34 = vadd.f32 %v281_v27, %v253_v31 }
  0xba   :  { %v255_v37 = vpop.f32.mrf.mxu2 }
  0xbb   :  { %v410_v35 = vmax.f32 %v224_v33, 0.0  ;;  %v411_v36 = vmax.f32 %v282_v34, 0.0 }
  0xbd   :  { %426 = vst [vmem:[%s981_s3 + $0x20] sm:$0xff] %v410_v35  ;;  %v284_v38 = vpop.f32.mrf.mxu3 }
  0xbe   :  { %427 = vst [vmem:[%s981_s3 + $0x28] sm:$0xff] %v411_v36  ;;  %v200_v39 = vpop.f32.mrf.mxu0 }
  0xc0   :  { %v167_v40 = vpop.permute.xlu1 %166 }
  0xc1   :  { %v198_v41 = vadd.f32 %v197_v28, %v167_v40  ;;  %v256_v42 = vadd.f32 %v255_v37, %v167_v40  ;;  %v229_v43 = vpop.f32.mrf.mxu1 }
  0xc3   :  { %v227_v44 = vadd.f32 %v226_v32, %v198_v41  ;;  %v285_v45 = vadd.f32 %v284_v38, %v256_v42 }
  0xc4   :  { %v258_v48 = vpop.f32.mrf.mxu2 }
  0xc5   :  { %v414_v46 = vmax.f32 %v227_v44, 0.0  ;;  %v415_v47 = vmax.f32 %v285_v45, 0.0 }
  0xc7   :  { %430 = vst [vmem:[%s981_s3 + $0x40] sm:$0xff] %v414_v46 }
  0xc8   :  { %431 = vst [vmem:[%s981_s3 + $0x48] sm:$0xff] %v415_v47  ;;  %v172_v49 = vpop.permute.xlu1 %171  ;;  %v287_v50 = vpop.f32.mrf.mxu3 }
  0xc9   :  { %v201_v51 = vadd.f32 %v200_v39, %v172_v49  ;;  %v259_v52 = vadd.f32 %v258_v48, %v172_v49  ;;  %v307_v53 = vpop.f32.mrf.mxu0 }
  0xca   :  { %v308_v54 = vadd.f32 %v307_v53, %v157_v17 }
  0xcb   :  { %v230_v55 = vadd.f32 %v229_v43, %v201_v51  ;;  %v288_v56 = vadd.f32 %v287_v50, %v259_v52  ;;  %v336_v57 = vpop.f32.mrf.mxu1 }
  0xcc   :  { %v337_v58 = vadd.f32 %v336_v57, %v308_v54 }
  0xcd   :  { %v418_v59 = vmax.f32 %v230_v55, 0.0  ;;  %v419_v60 = vmax.f32 %v288_v56, 0.0 }
  0xce   :  { %v408_v61 = vmax.f32 %v337_v58, 0.0 }
  0xcf   :  { %434 = vst [vmem:[%s981_s3 + $0x60] sm:$0xff] %v418_v59  ;;  %v365_v63 = vpop.f32.mrf.mxu2 }
  0xd0   :  { %435 = vst [vmem:[%s981_s3 + $0x68] sm:$0xff] %v419_v60  ;;  %v366_v0 = vadd.f32 %v365_v63, %v157_v17 }
  0xd1   :  { %424 = vst [vmem:[%s981_s3 + $0x10] sm:$0xff] %v408_v61  ;;  %v310_v1 = vpop.f32.mrf.mxu0 }
  0xd2   :  { %v311_v2 = vadd.f32 %v310_v1, %v162_v29  ;;  %v394_v4 = vpop.f32.mrf.mxu3 }
  0xd3   :  { %v395_v5 = vadd.f32 %v394_v4, %v366_v0  ;;  %v339_v6 = vpop.f32.mrf.mxu1 }
  0xd4   :  { %v340_v7 = vadd.f32 %v339_v6, %v311_v2 }
  0xd5   :  { %v409_v8 = vmax.f32 %v395_v5, 0.0 }
  0xd6   :  { %v412_v9 = vmax.f32 %v340_v7, 0.0 }
  0xd7   :  { %425 = vst [vmem:[%s981_s3 + $0x18] sm:$0xff] %v409_v8  ;;  %v368_v10 = vpop.f32.mrf.mxu2 }
  0xd8   :  { %428 = vst [vmem:[%s981_s3 + $0x30] sm:$0xff] %v412_v9  ;;  %v369_v11 = vadd.f32 %v368_v10, %v162_v29 }
  0xd9   :  { %v313_v12 = vpop.f32.mrf.mxu0 }
  0xda   :  { %v314_v13 = vadd.f32 %v313_v12, %v167_v40  ;;  %v397_v14 = vpop.f32.mrf.mxu3 }
  0xdb   :  { %v398_v62 = vadd.f32 %v397_v14, %v369_v11  ;;  %v342_v3 = vpop.f32.mrf.mxu1 }
  0xdc   :  { %v343_v15 = vadd.f32 %v342_v3, %v314_v13 }
  0xdd   :  { %v413_v16 = vmax.f32 %v398_v62, 0.0 }
  0xde   :  { %v416_v17 = vmax.f32 %v343_v15, 0.0 }
  0xdf   :  { %429 = vst [vmem:[%s981_s3 + $0x38] sm:$0xff] %v413_v16  ;;  %v371_v18 = vpop.f32.mrf.mxu2 }
  0xe0   :  { %432 = vst [vmem:[%s981_s3 + $0x50] sm:$0xff] %v416_v17  ;;  %v372_v19 = vadd.f32 %v371_v18, %v167_v40 }
  0xe1   :  { %v316_v20 = vpop.f32.mrf.mxu0 }
  0xe2   :  { %v317_v21 = vadd.f32 %v316_v20, %v172_v49  ;;  %v400_v22 = vpop.f32.mrf.mxu3 }
  0xe3   :  { %v401_v23 = vadd.f32 %v400_v22, %v372_v19  ;;  %v345_v24 = vpop.f32.mrf.mxu1 }
  0xe4   :  { %v346_v25 = vadd.f32 %v345_v24, %v317_v21 }
  0xe5   :  { %v417_v26 = vmax.f32 %v401_v23, 0.0 }
  0xe6   :  { %v420_v27 = vmax.f32 %v346_v25, 0.0 }
  0xe7   :  { %433 = vst [vmem:[%s981_s3 + $0x58] sm:$0xff] %v417_v26  ;;  %v374_v28 = vpop.f32.mrf.mxu2 }
  0xe8   :  { %436 = vst [vmem:[%s981_s3 + $0x70] sm:$0xff] %v420_v27  ;;  %v375_v29 = vadd.f32 %v374_v28, %v172_v49 }
  0xea   :  { %v403_v30 = vpop.f32.mrf.mxu3 }
  0xeb   :  { %v404_v31 = vadd.f32 %v403_v30, %v375_v29 }
  0xed   :  { %v421_v32 = vmax.f32 %v404_v31, 0.0 }
  0xef   :  { %437 = vst [vmem:[%s981_s3 + $0x78] sm:$0xff] %v421_v32 }

// kernel: fe_forward.7
= control target key start
LH: loop header
LB: loop body
LE: loop exit
PB: predicated region body
PF: predicated region fallthrough
CT: control target
= control target key end

     0   :  { %vm122_vm0 = vcmask 261120   ;;  %v334_v22 = vmov 0   ;;  %s647_s2 = inlined_call_operand.vmem [shape: f32[288,128], index: 2, kind: input, shape index: {}]   ;;  %s648_s0 = inlined_call_operand.vmem [shape: f32[64,288], index: 0, kind: input, shape index: {}]   ;;  %s649_s1 = inlined_call_operand.vmem [shape: f32[64,1], index: 1, kind: input, shape index: {}]   ;;  %s650_s3 = inlined_call_operand.vmem [shape: f32[64,128], index: 3, kind: output, shape index: {}]  }
   0x1   :  { %v53_v0 = vld [vmem:[%s647_s2 + $0x78] sm:$0xff]  ;;  %v52_v1 = vld [vmem:[%s647_s2 + $0x70] sm:$0xff]  ;;  %v51_v4 = vld [vmem:[%s647_s2 + $0x68] sm:$0xff]  ;;  %331 = vset.pattern.permute.xlu0 %v334_v22  ;;  %332 = vset.pattern.permute.xlu1 %v334_v22 }
   0x2   :  { %v364_v2 = vld [vmem:[%s647_s2 + $0xf8] sm:$0xff]  ;;  %147 = vmatpush.msra.mxu0 %v53_v0  ;;  %298 = vmatpush.msra.mxu3 %v53_v0  ;;  %v369_v3 = vld [vmem:[%s647_s2 + $0xf0] sm:$0xff]  ;;  %v378_v5 = vld [vmem:[%s647_s2 + $0xe8] sm:$0xff] }
   0x3   :  { %188 = vmatpush.msra.mxu1 %v364_v2  ;;  %v73_v6 = vld [vmem:[%s647_s2 + $0x118] sm:$0xff]  ;;  %v50_v7 = vld [vmem:[%s647_s2 + $0x60] sm:$0xff]  ;;  %v72_v8 = vld [vmem:[%s647_s2 + $0x110] sm:$0xff]  ;;  %333 = vset.pattern.permute.xlu2 %v334_v22 }
   0x4   :  { %148 = vmatpush.msra.mxu0 %v52_v1  ;;  %299 = vmatpush.msra.mxu3 %v52_v1  ;;  %v393_v9 = vld [vmem:[%s647_s2 + $0xe0] sm:$0xff]  ;;  %v71_v10 = vld [vmem:[%s647_s2 + $0x108] sm:$0xff]  ;;  %v49_v11 = vld [vmem:[%s647_s2 + $0x58] sm:$0xff] }
   0x5   :  { %189 = vmatpush.msra.mxu1 %v369_v3  ;;  %241 = vmatpush.msra.mxu2 %v73_v6  ;;  %v405_v12 = vld [vmem:[%s647_s2 + $0xd8] sm:$0xff]  ;;  %v70_v13 = vld [vmem:[%s647_s2 + $0x100] sm:$0xff]  ;;  %v48_v14 = vld [vmem:[%s647_s2 + $0x50] sm:$0xff] }
   0x6   :  { %149 = vmatpush.msra.mxu0 %v51_v4  ;;  %300 = vmatpush.msra.mxu3 %v51_v4  ;;  %v417_v15 = vld [vmem:[%s647_s2 + $0xd0] sm:$0xff]  ;;  %v47_v17 = vld [vmem:[%s647_s2 + $0x48] sm:$0xff]  ;;  %v46_v19 = vld [vmem:[%s647_s2 + $0x40] sm:$0xff] }
   0x7   :  { %190 = vmatpush.msra.mxu1 %v378_v5  ;;  %242 = vmatpush.msra.mxu2 %v72_v8  ;;  %v16_v16 = vld [vmem:[%s648_s0 + $0x10] sm:$0xff]  ;;  %v429_v18 = vld [vmem:[%s647_s2 + $0xc8] sm:$0xff]  ;;  %v439_v20 = vld [vmem:[%s647_s2 + $0xc0] sm:$0xff] }
   0x8   :  { %150 = vmatpush.msra.mxu0 %v50_v7  ;;  %301 = vmatpush.msra.mxu3 %v50_v7  ;;  %v45_v21 = vld [vmem:[%s647_s2 + $0x38] sm:$0xff]  ;;  %v74_v23 = vld [vmem:[%s649_s1] sm:$0xff]  ;;  %v44_v25 = vld [vmem:[%s647_s2 + $0x30] sm:$0xff] }
   0x9   :  { %191 = vmatpush.msra.mxu1 %v393_v9  ;;  %243 = vmatpush.msra.mxu2 %v71_v10  ;;  %v451_v24 = vld [vmem:[%s647_s2 + $0xb8] sm:$0xff]  ;;  %v460_v26 = vld [vmem:[%s647_s2 + $0xb0] sm:$0xff]  ;;  %v19_v27 = vld [vmem:[%s648_s0 + $0x28] sm:$0xff] }
   0xa   :  { %151 = vmatpush.msra.mxu0 %v49_v11  ;;  %302 = vmatpush.msra.mxu3 %v49_v11  ;;  %v43_v28 = vld [vmem:[%s647_s2 + $0x28] sm:$0xff]  ;;  %v42_v30 = vld [vmem:[%s647_s2 + $0x20] sm:$0xff]  ;;  %v76_v33 = vld [vmem:[%s649_s1 + $0x10] sm:$0xff] }
   0xb   :  { %192 = vmatpush.msra.mxu1 %v405_v12  ;;  %244 = vmatpush.msra.mxu2 %v70_v13  ;;  %v472_v29 = vld [vmem:[%s647_s2 + $0xa8] sm:$0xff]  ;;  %v482_v31 = vld [vmem:[%s647_s2 + $0xa0] sm:$0xff]  ;;  %v41_v34 = vld [vmem:[%s647_s2 + $0x18] sm:$0xff] }
   0xc   :  { %152 = vmatpush.msra.mxu0 %v48_v14  ;;  %303 = vmatpush.msra.mxu3 %v48_v14  ;;  %v75_v32 = vld [vmem:[%s649_s1 + $0x8] sm:$0xff]  ;;  %v497_v35 = vld [vmem:[%s647_s2 + $0x98] sm:$0xff]  ;;  %v40_v36 = vld [vmem:[%s647_s2 + $0x10] sm:$0xff] }
   0xd   :  { %193 = vmatpush.msra.mxu1 %v417_v15  ;;  %290 = vmatmul.msk.f32.vlgmr.msra.gmra.mxu2 %vm122_vm0, %v16_v16  ;;  %v506_v37 = vld [vmem:[%s647_s2 + $0x90] sm:$0xff]  ;;  %v22_v38 = vld [vmem:[%s648_s0 + $0x40] sm:$0xff]  ;;  %v39_v39 = vld [vmem:[%s647_s2 + $0x8] sm:$0xff] }
   0xe   :  { %153 = vmatpush.msra.mxu0 %v47_v17  ;;  %304 = vmatpush.msra.mxu3 %v47_v17  ;;  %v55_v40 = vld [vmem:[%s647_s2 + $0x88] sm:$0xff]  ;;  %v38_v41 = vld [vmem:[%s647_s2] sm:$0xff]  ;;  %v77_v43 = vld [vmem:[%s649_s1 + $0x18] sm:$0xff] }
   0xf   :  { %194 = vmatpush.msra.mxu1 %v429_v18  ;;  %84 = vperm.xlu0 %331, %v74_v23   ;;  %v14_v42 = vld [vmem:[%s648_s0] sm:$0xff]  ;;  %v32_v45 = vld [vmem:[%s648_s0 + $0x90] sm:$0xff]  ;;  %v15_v46 = vld [vmem:[%s648_s0 + $0x8] sm:$0xff] }
  0x10   :  { %154 = vmatpush.msra.mxu0 %v46_v19  ;;  %305 = vmatpush.msra.mxu3 %v46_v19  ;;  %v54_v44 = vld [vmem:[%s647_s2 + $0x80] sm:$0xff]  ;;  %v80_v47 = vld [vmem:[%s649_s1 + $0x30] sm:$0xff]  ;;  %v25_v48 = vld [vmem:[%s648_s0 + $0x58] sm:$0xff] }
  0x11   :  { %195 = vmatpush.msra.mxu1 %v439_v20  ;;  %94 = vperm.xlu1 %332, %v76_v33   ;;  %v81_v49 = vld [vmem:[%s649_s1 + $0x38] sm:$0xff]  ;;  %v35_v51 = vld [vmem:[%s648_s0 + $0xa8] sm:$0xff]  ;;  %v18_v52 = vld [vmem:[%s648_s0 + $0x20] sm:$0xff] }
  0x12   :  { %155 = vmatpush.msra.mxu0 %v45_v21  ;;  %306 = vmatpush.msra.mxu3 %v45_v21  ;;  %v17_v50 = vld [vmem:[%s648_s0 + $0x18] sm:$0xff]  ;;  %v28_v53 = vld [vmem:[%s648_s0 + $0x70] sm:$0xff]  ;;  %v78_v54 = vld [vmem:[%s649_s1 + $0x20] sm:$0xff] }
  0x13   :  { %196 = vmatpush.msra.mxu1 %v451_v24  ;;  %104 = vperm.xlu2 %333, %v78_v54   ;;  %v20_v55 = vld [vmem:[%s648_s0 + $0x30] sm:$0xff]  ;;  %v21_v56 = vld [vmem:[%s648_s0 + $0x38] sm:$0xff]  ;;  %v79_v57 = vld [vmem:[%s649_s1 + $0x28] sm:$0xff] }
  0x14   :  { %156 = vmatpush.msra.mxu0 %v44_v25  ;;  %307 = vmatpush.msra.mxu3 %v44_v25  ;;  %v31_v58 = vld [vmem:[%s648_s0 + $0x88] sm:$0xff]  ;;  %v24_v60 = vld [vmem:[%s648_s0 + $0x50] sm:$0xff]  ;;  %v34_v61 = vld [vmem:[%s648_s0 + $0xa0] sm:$0xff] }
  0x15   :  { %197 = vmatpush.msra.mxu1 %v460_v26  ;;  %291 = vmatmul.msk.f32.gmra.mxu2 %vm122_vm0, %v19_v27  ;;  %v23_v59 = vld [vmem:[%s648_s0 + $0x48] sm:$0xff]  ;;  %v33_v62 = vld [vmem:[%s648_s0 + $0x98] sm:$0xff]  ;;  %v26_v63 = vld [vmem:[%s648_s0 + $0x60] sm:$0xff] }
  0x16   :  { %157 = vmatpush.msra.mxu0 %v43_v28  ;;  %308 = vmatpush.msra.mxu3 %v43_v28  ;;  %v27_v0 = vld [vmem:[%s648_s0 + $0x68] sm:$0xff]  ;;  %v37_v1 = vld [vmem:[%s648_s0 + $0xb8] sm:$0xff]  ;;  %v30_v4 = vld [vmem:[%s648_s0 + $0x80] sm:$0xff] }
  0x17   :  { %198 = vmatpush.msra.mxu1 %v472_v29  ;;  %89 = vperm.xlu0 %331, %v75_v32  }
  0x18   :  { %158 = vmatpush.msra.mxu0 %v42_v30  ;;  %309 = vmatpush.msra.mxu3 %v42_v30 }
  0x19   :  { %199 = vmatpush.msra.mxu1 %v482_v31  ;;  %99 = vperm.xlu1 %332, %v77_v43  }
  0x1a   :  { %159 = vmatpush.msra.mxu0 %v41_v34  ;;  %310 = vmatpush.msra.mxu3 %v41_v34 }
  0x1b   :  { %200 = vmatpush.msra.mxu1 %v497_v35  ;;  %109 = vperm.xlu2 %333, %v79_v57  }
  0x1c   :  { %160 = vmatpush.msra.mxu0 %v40_v36  ;;  %311 = vmatpush.msra.mxu3 %v40_v36 }
  0x1d   :  { %201 = vmatpush.msra.mxu1 %v506_v37  ;;  %292 = vmatmul.msk.f32.gmra.mxu2 %vm122_vm0, %v22_v38 }
  0x1e   :  { %161 = vmatpush.msra.mxu0 %v39_v39  ;;  %312 = vmatpush.msra.mxu3 %v39_v39 }
  0x1f   :  { %202 = vmatpush.msra.mxu1 %v55_v40  ;;  %114 = vperm.xlu0 %331, %v80_v47  }
  0x20   :  { %162 = vmatpush.msra.mxu0 %v38_v41  ;;  %313 = vmatpush.msra.mxu3 %v38_v41 }
  0x21   :  { %163 = vmatmul.f32.vlgmr.msra.gmra.mxu0 %v14_v42  ;;  %203 = vmatpush.msra.mxu1 %v54_v44 }
  0x22   :  { %314 = vmatpush.msrb.mxu3 %v364_v2  ;;  %204 = vmatmul.f32.vlgmr.msra.gmra.mxu1 %v15_v46  ;;  %v36_v2 = vld [vmem:[%s648_s0 + $0xb0] sm:$0xff] }
  0x23   :  { %181 = vmatmul.f32.vlgmr.msra.gmra.mxu3 %v32_v45  ;;  %119 = vperm.xlu1 %332, %v81_v49  }
  0x24   :  { %315 = vmatpush.msrb.mxu3 %v369_v3  ;;  %v29_v3 = vld [vmem:[%s648_s0 + $0x78] sm:$0xff] }
  0x25   :  { %293 = vmatmul.msk.f32.gmra.mxu2 %vm122_vm0, %v25_v48 }
  0x26   :  { %316 = vmatpush.msrb.mxu3 %v378_v5 }
  0x28   :  { %317 = vmatpush.msrb.mxu3 %v393_v9 }
  0x29   :  { %166 = vmatmul.f32.gmra.mxu0 %v17_v50 }
  0x2a   :  { %318 = vmatpush.msrb.mxu3 %v405_v12  ;;  %207 = vmatmul.f32.gmra.mxu1 %v18_v52 }
  0x2b   :  { %184 = vmatmul.f32.gmra.mxu3 %v35_v51 }
  0x2c   :  { %319 = vmatpush.msrb.mxu3 %v417_v15 }
  0x2d   :  { %294 = vmatmul.msk.f32.gmra.mxu2 %vm122_vm0, %v28_v53 }
  0x2e   :  { %320 = vmatpush.msrb.mxu3 %v429_v18 }
  0x30   :  { %321 = vmatpush.msrb.mxu3 %v439_v20 }
  0x31   :  { %169 = vmatmul.f32.gmra.mxu0 %v20_v55 }
  0x32   :  { %322 = vmatpush.msrb.mxu3 %v451_v24  ;;  %210 = vmatmul.f32.gmra.mxu1 %v21_v56 }
  0x34   :  { %323 = vmatpush.msrb.mxu3 %v460_v26 }
  0x35   :  { %295 = vmatmul.msk.f32.gmra.mxu2 %vm122_vm0, %v31_v58 }
  0x36   :  { %324 = vmatpush.msrb.mxu3 %v472_v29 }
  0x38   :  { %325 = vmatpush.msrb.mxu3 %v482_v31 }
  0x39   :  { %172 = vmatmul.f32.gmra.mxu0 %v23_v59 }
  0x3a   :  { %326 = vmatpush.msrb.mxu3 %v497_v35  ;;  %213 = vmatmul.f32.gmra.mxu1 %v24_v60 }
  0x3c   :  { %327 = vmatpush.msrb.mxu3 %v506_v37 }
  0x3d   :  { %296 = vmatmul.msk.f32.gmra.mxu2 %vm122_vm0, %v34_v61 }
  0x3e   :  { %328 = vmatpush.msrb.mxu3 %v55_v40 }
  0x40   :  { %329 = vmatpush.msrb.mxu3 %v54_v44 }
  0x41   :  { %222 = vmatmul.f32.vlgmr.msrb.gmra.mxu3 %v33_v62  ;;  %175 = vmatmul.f32.gmra.mxu0 %v26_v63 }
  0x42   :  { %216 = vmatmul.f32.gmra.mxu1 %v27_v0 }
  0x45   :  { %297 = vmatmul.msk.f32.gmra.mxu2 %vm122_vm0, %v37_v1 }
  0x49   :  { %225 = vmatmul.f32.gmra.mxu3 %v36_v2  ;;  %178 = vmatmul.f32.gmra.mxu0 %v29_v3 }
  0x4a   :  { %219 = vmatmul.f32.gmra.mxu1 %v30_v4 }
  0x6d   :  { %v105_v40 = vpop.permute.xlu2 %104 }
  0x75   :  { %v110_v53 = vpop.permute.xlu2 %109 }
  0x81   :  { %v85_v7 = vpop.permute.xlu0 %84 }
  0x83   :  { %v95_v22 = vpop.permute.xlu1 %94 }
  0x89   :  { %v90_v14 = vpop.permute.xlu0 %89 }
  0x8b   :  { %v100_v32 = vpop.permute.xlu1 %99 }
  0x90   :  { %v246_v5 = vpop.f32.mrf.mxu2 }
  0x91   :  { %v115_v43 = vpop.permute.xlu0 %114 }
  0x95   :  { %v120_v56 = vpop.permute.xlu1 %119 }
  0x98   :  { %v249_v6 = vpop.f32.mrf.mxu2 }
  0x9e   :  { %v164_v8 = vpop.f32.mrf.mxu0 }
  0x9f   :  { %v165_v9 = vadd.f32 %v164_v8, %v85_v7  ;;  %v205_v10 = vpop.f32.mrf.mxu1 }
  0xa0   :  { %v252_v11 = vpop.f32.mrf.mxu2 }
  0xa1   :  { %v206_v12 = vadd.f32 %v205_v10, %v165_v9 }
  0xa3   :  { %v247_v13 = vadd.f32 %v246_v5, %v206_v12 }
  0xa5   :  { %v270_v15 = vmax.f32 %v247_v13, 0.0 }
  0xa6   :  { %v167_v16 = vpop.f32.mrf.mxu0  ;;  %v182_v29 = vpop.f32.mrf.mxu3 }
  0xa7   :  { %278 = vst [vmem:[%s650_s3] sm:$0xff] %v270_v15  ;;  %v168_v17 = vadd.f32 %v167_v16, %v90_v14  ;;  %v208_v18 = vpop.f32.mrf.mxu1  ;;  %v183_v48 = vadd.f32 %v182_v29, %v115_v43 }
  0xa8   :  { %v255_v19 = vpop.f32.mrf.mxu2 }
  0xa9   :  { %v209_v20 = vadd.f32 %v208_v18, %v168_v17 }
  0xab   :  { %v250_v21 = vadd.f32 %v249_v6, %v209_v20 }
  0xad   :  { %v271_v23 = vmax.f32 %v250_v21, 0.0 }
  0xae   :  { %v170_v24 = vpop.f32.mrf.mxu0  ;;  %v185_v39 = vpop.f32.mrf.mxu3 }
  0xaf   :  { %279 = vst [vmem:[%s650_s3 + $0x8] sm:$0xff] %v271_v23  ;;  %v171_v25 = vadd.f32 %v170_v24, %v95_v22  ;;  %v211_v26 = vpop.f32.mrf.mxu1  ;;  %v186_v61 = vadd.f32 %v185_v39, %v120_v56 }
  0xb0   :  { %v258_v27 = vpop.f32.mrf.mxu2 }
  0xb1   :  { %v212_v28 = vadd.f32 %v211_v26, %v171_v25 }
  0xb3   :  { %v253_v30 = vadd.f32 %v252_v11, %v212_v28 }
  0xb5   :  { %v272_v31 = vmax.f32 %v253_v30, 0.0 }
  0xb6   :  { %v173_v33 = vpop.f32.mrf.mxu0 }
  0xb7   :  { %280 = vst [vmem:[%s650_s3 + $0x10] sm:$0xff] %v272_v31  ;;  %v174_v34 = vadd.f32 %v173_v33, %v100_v32  ;;  %v214_v35 = vpop.f32.mrf.mxu1 }
  0xb8   :  { %v261_v36 = vpop.f32.mrf.mxu2 }
  0xb9   :  { %v215_v37 = vadd.f32 %v214_v35, %v174_v34 }
  0xbb   :  { %v256_v38 = vadd.f32 %v255_v19, %v215_v37 }
  0xbd   :  { %v273_v41 = vmax.f32 %v256_v38, 0.0 }
  0xbe   :  { %v176_v42 = vpop.f32.mrf.mxu0 }
  0xbf   :  { %281 = vst [vmem:[%s650_s3 + $0x18] sm:$0xff] %v273_v41  ;;  %v177_v44 = vadd.f32 %v176_v42, %v105_v40  ;;  %v217_v45 = vpop.f32.mrf.mxu1 }
  0xc0   :  { %v264_v47 = vpop.f32.mrf.mxu2 }
  0xc1   :  { %v218_v46 = vadd.f32 %v217_v45, %v177_v44 }
  0xc3   :  { %v259_v49 = vadd.f32 %v258_v27, %v218_v46 }
  0xc4   :  { %v223_v50 = vpop.f32.mrf.mxu3 }
  0xc5   :  { %v224_v51 = vadd.f32 %v223_v50, %v183_v48  ;;  %v274_v52 = vmax.f32 %v259_v49, 0.0 }
  0xc6   :  { %v179_v55 = vpop.f32.mrf.mxu0 }
  0xc7   :  { %v265_v54 = vadd.f32 %v264_v47, %v224_v51  ;;  %282 = vst [vmem:[%s650_s3 + $0x20] sm:$0xff] %v274_v52  ;;  %v180_v57 = vadd.f32 %v179_v55, %v110_v53  ;;  %v220_v59 = vpop.f32.mrf.mxu1 }
  0xc8   :  { %v267_v0 = vpop.f32.mrf.mxu2 }
  0xc9   :  { %v276_v58 = vmax.f32 %v265_v54, 0.0  ;;  %v221_v60 = vadd.f32 %v220_v59, %v180_v57 }
  0xcb   :  { %284 = vst [vmem:[%s650_s3 + $0x30] sm:$0xff] %v276_v58  ;;  %v262_v62 = vadd.f32 %v261_v36, %v221_v60 }
  0xcc   :  { %v226_v63 = vpop.f32.mrf.mxu3 }
  0xcd   :  { %v227_v1 = vadd.f32 %v226_v63, %v186_v61  ;;  %v275_v2 = vmax.f32 %v262_v62, 0.0 }
  0xcf   :  { %v268_v3 = vadd.f32 %v267_v0, %v227_v1  ;;  %283 = vst [vmem:[%s650_s3 + $0x28] sm:$0xff] %v275_v2 }
  0xd1   :  { %v277_v4 = vmax.f32 %v268_v3, 0.0 }
  0xd3   :  { %285 = vst [vmem:[%s650_s3 + $0x38] sm:$0xff] %v277_v4 }

// kernel: fe_forward.8
= control target key start
LH: loop header
LB: loop body
LE: loop exit
PB: predicated region body
PF: predicated region fallthrough
CT: control target
= control target key end

     0   :  { %v468_v19 = vmov 0   ;;  %vm174_vm0 = vcmask 523264   ;;  %s893_s2 = inlined_call_operand.vmem [shape: f32[576,128], index: 2, kind: input, shape index: {}]   ;;  %s894_s1 = inlined_call_operand.vmem [shape: f32[64,1], index: 1, kind: input, shape index: {}]   ;;  %s895_s0 = inlined_call_operand.vmem [shape: f32[64,576], index: 0, kind: input, shape index: {}]   ;;  %s896_s3 = inlined_call_operand.vmem [shape: f32[64,128], index: 3, kind: output, shape index: {}]  }
   0x1   :  { %v69_v0 = vld [vmem:[%s893_s2 + $0x78] sm:$0xff]  ;;  %v68_v1 = vld [vmem:[%s893_s2 + $0x70] sm:$0xff]  ;;  %v67_v2 = vld [vmem:[%s893_s2 + $0x68] sm:$0xff]  ;;  %466 = vset.pattern.permute.xlu1 %v468_v19  ;;  %465 = vset.pattern.permute.xlu0 %v468_v19 }
   0x2   :  { %432 = vmatpush.msra.mxu1 %v69_v0  ;;  %433 = vmatpush.msra.mxu2 %v69_v0  ;;  %v66_v3 = vld [vmem:[%s893_s2 + $0x60] sm:$0xff]  ;;  %v65_v4 = vld [vmem:[%s893_s2 + $0x58] sm:$0xff]  ;;  %v116_v6 = vld [vmem:[%s893_s2 + $0x1f0] sm:$0xff] }
   0x3   :  { %199 = vmatpush.msra.mxu0 %v69_v0  ;;  %v117_v5 = vld [vmem:[%s893_s2 + $0x1f8] sm:$0xff]  ;;  %v64_v7 = vld [vmem:[%s893_s2 + $0x50] sm:$0xff]  ;;  %v115_v8 = vld [vmem:[%s893_s2 + $0x1e8] sm:$0xff]  ;;  %467 = vset.pattern.permute.xlu2 %v468_v19 }
   0x4   :  { %434 = vmatpush.msra.mxu1 %v68_v1  ;;  %435 = vmatpush.msra.mxu2 %v68_v1  ;;  %v63_v9 = vld [vmem:[%s893_s2 + $0x48] sm:$0xff]  ;;  %v114_v10 = vld [vmem:[%s893_s2 + $0x1e0] sm:$0xff]  ;;  %v113_v12 = vld [vmem:[%s893_s2 + $0x1d8] sm:$0xff] }
   0x5   :  { %200 = vmatpush.msra.mxu0 %v68_v1  ;;  %322 = vmatpush.msra.mxu3 %v117_v5  ;;  %v62_v11 = vld [vmem:[%s893_s2 + $0x40] sm:$0xff]  ;;  %v61_v13 = vld [vmem:[%s893_s2 + $0x38] sm:$0xff]  ;;  %v112_v14 = vld [vmem:[%s893_s2 + $0x1d0] sm:$0xff] }
   0x6   :  { %436 = vmatpush.msra.mxu1 %v67_v2  ;;  %437 = vmatpush.msra.mxu2 %v67_v2  ;;  %v60_v15 = vld [vmem:[%s893_s2 + $0x30] sm:$0xff]  ;;  %v59_v16 = vld [vmem:[%s893_s2 + $0x28] sm:$0xff]  ;;  %v58_v18 = vld [vmem:[%s893_s2 + $0x20] sm:$0xff] }
   0x7   :  { %201 = vmatpush.msra.mxu0 %v67_v2  ;;  %323 = vmatpush.msra.mxu3 %v116_v6  ;;  %v111_v17 = vld [vmem:[%s893_s2 + $0x1c8] sm:$0xff]  ;;  %v128_v20 = vld [vmem:[%s894_s1 + $0x10] sm:$0xff]  ;;  %v57_v21 = vld [vmem:[%s893_s2 + $0x18] sm:$0xff] }
   0x8   :  { %438 = vmatpush.msra.mxu1 %v66_v3  ;;  %439 = vmatpush.msra.mxu2 %v66_v3  ;;  %v110_v22 = vld [vmem:[%s893_s2 + $0x1c0] sm:$0xff]  ;;  %v56_v23 = vld [vmem:[%s893_s2 + $0x10] sm:$0xff]  ;;  %v55_v25 = vld [vmem:[%s893_s2 + $0x8] sm:$0xff] }
   0x9   :  { %202 = vmatpush.msra.mxu0 %v66_v3  ;;  %324 = vmatpush.msra.mxu3 %v115_v8  ;;  %v126_v24 = vld [vmem:[%s894_s1] sm:$0xff]  ;;  %v109_v26 = vld [vmem:[%s893_s2 + $0x1b8] sm:$0xff]  ;;  %v24_v28 = vld [vmem:[%s895_s0 + $0x50] sm:$0xff] }
   0xa   :  { %440 = vmatpush.msra.mxu1 %v65_v4  ;;  %441 = vmatpush.msra.mxu2 %v65_v4  ;;  %v54_v27 = vld [vmem:[%s893_s2] sm:$0xff]  ;;  %v101_v29 = vld [vmem:[%s893_s2 + $0x178] sm:$0xff]  ;;  %v44_v31 = vld [vmem:[%s895_s0 + $0xf0] sm:$0xff] }
   0xb   :  { %203 = vmatpush.msra.mxu0 %v65_v4  ;;  %325 = vmatpush.msra.mxu3 %v114_v10  ;;  %v85_v30 = vld [vmem:[%s893_s2 + $0xf8] sm:$0xff]  ;;  %v100_v32 = vld [vmem:[%s893_s2 + $0x170] sm:$0xff]  ;;  %v99_v35 = vld [vmem:[%s893_s2 + $0x168] sm:$0xff] }
   0xc   :  { %442 = vmatpush.msra.mxu1 %v64_v7  ;;  %443 = vmatpush.msra.mxu2 %v64_v7  ;;  %v108_v33 = vld [vmem:[%s893_s2 + $0x1b0] sm:$0xff]  ;;  %v107_v36 = vld [vmem:[%s893_s2 + $0x1a8] sm:$0xff]  ;;  %v129_v38 = vld [vmem:[%s894_s1 + $0x18] sm:$0xff] }
   0xd   :  { %204 = vmatpush.msra.mxu0 %v64_v7  ;;  %326 = vmatpush.msra.mxu3 %v113_v12  ;;  %v84_v34 = vld [vmem:[%s893_s2 + $0xf0] sm:$0xff]  ;;  %v83_v37 = vld [vmem:[%s893_s2 + $0xe8] sm:$0xff]  ;;  %v98_v39 = vld [vmem:[%s893_s2 + $0x160] sm:$0xff] }
   0xe   :  { %444 = vmatpush.msra.mxu1 %v63_v9  ;;  %445 = vmatpush.msra.mxu2 %v63_v9  ;;  %v82_v40 = vld [vmem:[%s893_s2 + $0xe0] sm:$0xff]  ;;  %v29_v42 = vld [vmem:[%s895_s0 + $0x78] sm:$0xff]  ;;  %v96_v46 = vld [vmem:[%s893_s2 + $0x150] sm:$0xff] }
   0xf   :  { %205 = vmatpush.msra.mxu0 %v63_v9  ;;  %327 = vmatpush.msra.mxu3 %v112_v14  ;;  %v106_v41 = vld [vmem:[%s893_s2 + $0x1a0] sm:$0xff]  ;;  %v97_v43 = vld [vmem:[%s893_s2 + $0x158] sm:$0xff]  ;;  %v127_v47 = vld [vmem:[%s894_s1 + $0x8] sm:$0xff] }
  0x10   :  { %446 = vmatpush.msra.mxu1 %v62_v11  ;;  %447 = vmatpush.msra.mxu2 %v62_v11  ;;  %v81_v44 = vld [vmem:[%s893_s2 + $0xd8] sm:$0xff]  ;;  %v80_v48 = vld [vmem:[%s893_s2 + $0xd0] sm:$0xff]  ;;  %v14_v49 = vld [vmem:[%s895_s0] sm:$0xff] }
  0x11   :  { %206 = vmatpush.msra.mxu0 %v62_v11  ;;  %328 = vmatpush.msra.mxu3 %v111_v17  ;;  %v49_v45 = vld [vmem:[%s895_s0 + $0x118] sm:$0xff]  ;;  %v95_v50 = vld [vmem:[%s893_s2 + $0x148] sm:$0xff]  ;;  %v94_v54 = vld [vmem:[%s893_s2 + $0x140] sm:$0xff] }
  0x12   :  { %448 = vmatpush.msra.mxu1 %v61_v13  ;;  %449 = vmatpush.msra.mxu2 %v61_v13  ;;  %v125_v51 = vld [vmem:[%s893_s2 + $0x238] sm:$0xff]  ;;  %v79_v52 = vld [vmem:[%s893_s2 + $0xc8] sm:$0xff]  ;;  %v124_v55 = vld [vmem:[%s893_s2 + $0x230] sm:$0xff] }
  0x13   :  { %207 = vmatpush.msra.mxu0 %v61_v13  ;;  %146 = vperm.xlu1 %466, %v128_v20   ;;  %v105_v53 = vld [vmem:[%s893_s2 + $0x198] sm:$0xff]  ;;  %v78_v56 = vld [vmem:[%s893_s2 + $0xc0] sm:$0xff]  ;;  %v104_v57 = vld [vmem:[%s893_s2 + $0x190] sm:$0xff] }
  0x14   :  { %450 = vmatpush.msra.mxu1 %v60_v15  ;;  %451 = vmatpush.msra.mxu2 %v60_v15  ;;  %v93_v58 = vld [vmem:[%s893_s2 + $0x138] sm:$0xff]  ;;  %v34_v59 = vld [vmem:[%s895_s0 + $0xa0] sm:$0xff]  ;;  %v123_v61 = vld [vmem:[%s893_s2 + $0x228] sm:$0xff] }
  0x15   :  { %208 = vmatpush.msra.mxu0 %v60_v15  ;;  %329 = vmatpush.msra.mxu3 %v110_v22  ;;  %v77_v60 = vld [vmem:[%s893_s2 + $0xb8] sm:$0xff]  ;;  %v92_v62 = vld [vmem:[%s893_s2 + $0x130] sm:$0xff]  ;;  %v103_v63 = vld [vmem:[%s893_s2 + $0x188] sm:$0xff] }
  0x16   :  { %452 = vmatpush.msra.mxu1 %v59_v16  ;;  %453 = vmatpush.msra.mxu2 %v59_v16  ;;  %v76_v0 = vld [vmem:[%s893_s2 + $0xb0] sm:$0xff]  ;;  %v122_v1 = vld [vmem:[%s893_s2 + $0x220] sm:$0xff]  ;;  %v91_v2 = vld [vmem:[%s893_s2 + $0x128] sm:$0xff] }
  0x17   :  { %209 = vmatpush.msra.mxu0 %v59_v16  ;;  %136 = vperm.xlu0 %465, %v126_v24   ;;  %v102_v3 = vld [vmem:[%s893_s2 + $0x180] sm:$0xff]  ;;  %v75_v4 = vld [vmem:[%s893_s2 + $0xa8] sm:$0xff]  ;;  %v132_v5 = vld [vmem:[%s894_s1 + $0x30] sm:$0xff] }
  0x18   :  { %454 = vmatpush.msra.mxu1 %v58_v18  ;;  %455 = vmatpush.msra.mxu2 %v58_v18  ;;  %v90_v6 = vld [vmem:[%s893_s2 + $0x120] sm:$0xff]  ;;  %v19_v7 = vld [vmem:[%s895_s0 + $0x28] sm:$0xff]  ;;  %v17_v9 = vld [vmem:[%s895_s0 + $0x18] sm:$0xff] }
  0x19   :  { %210 = vmatpush.msra.mxu0 %v58_v18  ;;  %330 = vmatpush.msra.mxu3 %v109_v26  ;;  %v74_v8 = vld [vmem:[%s893_s2 + $0xa0] sm:$0xff]  ;;  %v89_v10 = vld [vmem:[%s893_s2 + $0x118] sm:$0xff]  ;;  %v39_v11 = vld [vmem:[%s895_s0 + $0xc8] sm:$0xff] }
  0x1a   :  { %456 = vmatpush.msra.mxu1 %v57_v21  ;;  %457 = vmatpush.msra.mxu2 %v57_v21  ;;  %v73_v12 = vld [vmem:[%s893_s2 + $0x98] sm:$0xff]  ;;  %v88_v14 = vld [vmem:[%s893_s2 + $0x110] sm:$0xff]  ;;  %v87_v18 = vld [vmem:[%s893_s2 + $0x108] sm:$0xff] }
  0x1b   :  { %211 = vmatpush.msra.mxu0 %v57_v21  ;;  %331 = vmatpush.msra.mxu3 %v108_v33  ;;  %v121_v13 = vld [vmem:[%s893_s2 + $0x218] sm:$0xff]  ;;  %v72_v16 = vld [vmem:[%s893_s2 + $0x90] sm:$0xff]  ;;  %v71_v20 = vld [vmem:[%s893_s2 + $0x88] sm:$0xff] }
  0x1c   :  { %458 = vmatpush.msra.mxu1 %v56_v23  ;;  %459 = vmatpush.msra.mxu2 %v56_v23  ;;  %v133_v15 = vld [vmem:[%s894_s1 + $0x38] sm:$0xff]  ;;  %v120_v17 = vld [vmem:[%s893_s2 + $0x210] sm:$0xff]  ;;  %v119_v21 = vld [vmem:[%s893_s2 + $0x208] sm:$0xff] }
  0x1d   :  { %212 = vmatpush.msra.mxu0 %v56_v23  ;;  %332 = vmatpush.msra.mxu3 %v107_v36  ;;  %v86_v22 = vld [vmem:[%s893_s2 + $0x100] sm:$0xff]  ;;  %v15_v26 = vld [vmem:[%s895_s0 + $0x8] sm:$0xff]  ;;  %v32_v36 = vld [vmem:[%s895_s0 + $0x90] sm:$0xff] }
  0x1e   :  { %460 = vmatpush.msra.mxu1 %v55_v25  ;;  %461 = vmatpush.msra.mxu2 %v55_v25  ;;  %v130_v23 = vld [vmem:[%s894_s1 + $0x20] sm:$0xff]  ;;  %v131_v19 = vld [vmem:[%s894_s1 + $0x28] sm:$0xff] }
  0x1f   :  { %213 = vmatpush.msra.mxu0 %v55_v25  ;;  %151 = vperm.xlu1 %466, %v129_v38   ;;  %v70_v24 = vld [vmem:[%s893_s2 + $0x80] sm:$0xff]  ;;  %v16_v25 = vld [vmem:[%s895_s0 + $0x10] sm:$0xff]  ;;  %v23_v33 = vld [vmem:[%s895_s0 + $0x48] sm:$0xff] }
  0x20   :  { %462 = vmatpush.msra.mxu1 %v54_v27  ;;  %463 = vmatpush.msra.mxu2 %v54_v27  ;;  %v31_v38 = vld [vmem:[%s895_s0 + $0x88] sm:$0xff] }
  0x21   :  { %221 = vmatmul.f32.vlgmr.msra.gmra.mxu1 %v24_v28  ;;  %233 = vmatmul.f32.vlgmr.msra.gmra.mxu2 %v44_v31  ;;  %v22_v28 = vld [vmem:[%s895_s0 + $0x40] sm:$0xff]  ;;  %v20_v31 = vld [vmem:[%s895_s0 + $0x30] sm:$0xff] }
  0x22   :  { %281 = vmatpush.msrb.mxu2 %v101_v29  ;;  %240 = vmatpush.msrb.mxu1 %v85_v30  ;;  %v18_v29 = vld [vmem:[%s895_s0 + $0x20] sm:$0xff]  ;;  %v21_v30 = vld [vmem:[%s895_s0 + $0x38] sm:$0xff] }
  0x23   :  { %214 = vmatpush.msra.mxu0 %v54_v27  ;;  %333 = vmatpush.msra.mxu3 %v106_v41  ;;  %v118_v27 = vld [vmem:[%s893_s2 + $0x200] sm:$0xff]  ;;  %v33_v41 = vld [vmem:[%s895_s0 + $0x98] sm:$0xff] }
  0x24   :  { %282 = vmatpush.msrb.mxu2 %v100_v32  ;;  %241 = vmatpush.msrb.mxu1 %v84_v34  ;;  %v27_v32 = vld [vmem:[%s895_s0 + $0x68] sm:$0xff]  ;;  %v26_v34 = vld [vmem:[%s895_s0 + $0x60] sm:$0xff] }
  0x25   :  { %141 = vperm.xlu0 %465, %v127_v47   ;;  %215 = vmatmul.f32.vlgmr.msra.gmra.mxu0 %v14_v49  ;;  %v40_v47 = vld [vmem:[%s895_s0 + $0xd0] sm:$0xff]  ;;  %v43_v49 = vld [vmem:[%s895_s0 + $0xe8] sm:$0xff] }
  0x26   :  { %283 = vmatpush.msrb.mxu2 %v99_v35  ;;  %242 = vmatpush.msrb.mxu1 %v83_v37  ;;  %v25_v35 = vld [vmem:[%s895_s0 + $0x58] sm:$0xff]  ;;  %v28_v37 = vld [vmem:[%s895_s0 + $0x70] sm:$0xff] }
  0x27   :  { %371 = vmatpush.msrb.mxu0 %v125_v51  ;;  %334 = vmatpush.msra.mxu3 %v105_v53  ;;  %v45_v51 = vld [vmem:[%s895_s0 + $0xf8] sm:$0xff]  ;;  %v48_v53 = vld [vmem:[%s895_s0 + $0x110] sm:$0xff] }
  0x28   :  { %284 = vmatpush.msrb.mxu2 %v98_v39  ;;  %243 = vmatpush.msrb.mxu1 %v82_v40  ;;  %v30_v39 = vld [vmem:[%s895_s0 + $0x80] sm:$0xff]  ;;  %v37_v40 = vld [vmem:[%s895_s0 + $0xb8] sm:$0xff] }
  0x29   :  { %224 = vmatmul.f32.gmra.mxu1 %v29_v42  ;;  %236 = vmatmul.f32.gmra.mxu2 %v49_v45  ;;  %v36_v42 = vld [vmem:[%s895_s0 + $0xb0] sm:$0xff]  ;;  %v38_v45 = vld [vmem:[%s895_s0 + $0xc0] sm:$0xff] }
  0x2a   :  { %285 = vmatpush.msrb.mxu2 %v97_v43  ;;  %244 = vmatpush.msrb.mxu1 %v81_v44  ;;  %v35_v43 = vld [vmem:[%s895_s0 + $0xa8] sm:$0xff]  ;;  %v42_v44 = vld [vmem:[%s895_s0 + $0xe0] sm:$0xff] }
  0x2b   :  { %372 = vmatpush.msrb.mxu0 %v124_v55  ;;  %335 = vmatpush.msra.mxu3 %v104_v57  ;;  %v50_v55 = vld [vmem:[%s895_s0 + $0x120] sm:$0xff] }
  0x2c   :  { %286 = vmatpush.msrb.mxu2 %v96_v46  ;;  %245 = vmatpush.msrb.mxu1 %v80_v48  ;;  %v41_v46 = vld [vmem:[%s895_s0 + $0xd8] sm:$0xff]  ;;  %v47_v48 = vld [vmem:[%s895_s0 + $0x108] sm:$0xff] }
  0x2d   :  { %373 = vmatpush.msrb.mxu0 %v123_v61  ;;  %336 = vmatpush.msra.mxu3 %v103_v63 }
  0x2e   :  { %287 = vmatpush.msrb.mxu2 %v95_v50  ;;  %246 = vmatpush.msrb.mxu1 %v79_v52  ;;  %v46_v50 = vld [vmem:[%s895_s0 + $0x100] sm:$0xff]  ;;  %v52_v52 = vld [vmem:[%s895_s0 + $0x130] sm:$0xff] }
  0x2f   :  { %374 = vmatpush.msrb.mxu0 %v122_v1  ;;  %337 = vmatpush.msra.mxu3 %v102_v3 }
  0x30   :  { %288 = vmatpush.msrb.mxu2 %v94_v54  ;;  %247 = vmatpush.msrb.mxu1 %v78_v56  ;;  %v51_v54 = vld [vmem:[%s895_s0 + $0x128] sm:$0xff]  ;;  %v53_v56 = vld [vmem:[%s895_s0 + $0x138] sm:$0xff] }
  0x31   :  { %227 = vmatmul.f32.gmra.mxu1 %v34_v59  ;;  %166 = vperm.xlu0 %465, %v132_v5  }
  0x32   :  { %289 = vmatpush.msrb.mxu2 %v93_v58  ;;  %248 = vmatpush.msrb.mxu1 %v77_v60 }
  0x33   :  { %218 = vmatmul.f32.gmra.mxu0 %v19_v7  ;;  %338 = vmatmul.f32.vlgmr.msra.gmra.mxu3 %v17_v9 }
  0x34   :  { %290 = vmatpush.msrb.mxu2 %v92_v62  ;;  %249 = vmatpush.msrb.mxu1 %v76_v0 }
  0x35   :  { %375 = vmatpush.msrb.mxu0 %v121_v13  ;;  %171 = vperm.xlu1 %466, %v133_v15  }
  0x36   :  { %291 = vmatpush.msrb.mxu2 %v91_v2  ;;  %250 = vmatpush.msrb.mxu1 %v75_v4 }
  0x37   :  { %376 = vmatpush.msrb.mxu0 %v120_v17  ;;  %156 = vperm.xlu2 %467, %v130_v23  }
  0x38   :  { %292 = vmatpush.msrb.mxu2 %v90_v6  ;;  %251 = vmatpush.msrb.mxu1 %v74_v8 }
  0x39   :  { %230 = vmatmul.f32.gmra.mxu1 %v39_v11  ;;  %377 = vmatpush.msrb.mxu0 %v119_v21 }
  0x3a   :  { %293 = vmatpush.msrb.mxu2 %v89_v10  ;;  %252 = vmatpush.msrb.mxu1 %v73_v12 }
  0x3b   :  { %378 = vmatpush.msrb.mxu0 %v118_v27  ;;  %341 = vmatmul.f32.gmra.mxu3 %v22_v28 }
  0x3c   :  { %294 = vmatpush.msrb.mxu2 %v88_v14  ;;  %253 = vmatpush.msrb.mxu1 %v72_v16 }
  0x3d   :  { %424 = vmatmul.msk.f32.vlgmr.msrb.gmra.mxu0 %vm174_vm0, %v18_v29 }
  0x3e   :  { %295 = vmatpush.msrb.mxu2 %v87_v18  ;;  %254 = vmatpush.msrb.mxu1 %v71_v20 }
  0x3f   :  { %161 = vperm.xlu2 %467, %v131_v19  }
  0x40   :  { %296 = vmatpush.msrb.mxu2 %v86_v22  ;;  %255 = vmatpush.msrb.mxu1 %v70_v24 }
  0x41   :  { %297 = vmatmul.f32.vlgmr.msrb.gmra.mxu2 %v16_v25  ;;  %256 = vmatmul.f32.vlgmr.msrb.gmra.mxu1 %v15_v26 }
  0x43   :  { %344 = vmatmul.f32.gmra.mxu3 %v27_v32 }
  0x45   :  { %425 = vmatmul.msk.f32.gmra.mxu0 %vm174_vm0, %v23_v33 }
  0x49   :  { %300 = vmatmul.f32.gmra.mxu2 %v21_v30  ;;  %259 = vmatmul.f32.gmra.mxu1 %v20_v31 }
  0x4b   :  { %347 = vmatmul.f32.gmra.mxu3 %v32_v36 }
  0x4d   :  { %426 = vmatmul.msk.f32.gmra.mxu0 %vm174_vm0, %v28_v37 }
  0x51   :  { %303 = vmatmul.f32.gmra.mxu2 %v26_v34  ;;  %262 = vmatmul.f32.gmra.mxu1 %v25_v35 }
  0x53   :  { %350 = vmatmul.f32.gmra.mxu3 %v37_v40 }
  0x55   :  { %427 = vmatmul.msk.f32.gmra.mxu0 %vm174_vm0, %v33_v41 }
  0x59   :  { %306 = vmatmul.f32.gmra.mxu2 %v31_v38  ;;  %265 = vmatmul.f32.gmra.mxu1 %v30_v39 }
  0x5b   :  { %353 = vmatmul.f32.gmra.mxu3 %v42_v44 }
  0x5d   :  { %428 = vmatmul.msk.f32.gmra.mxu0 %vm174_vm0, %v38_v45 }
  0x61   :  { %309 = vmatmul.f32.gmra.mxu2 %v36_v42  ;;  %268 = vmatmul.f32.gmra.mxu1 %v35_v43 }
  0x63   :  { %356 = vmatmul.f32.gmra.mxu3 %v47_v48 }
  0x65   :  { %429 = vmatmul.msk.f32.gmra.mxu0 %vm174_vm0, %v43_v49 }
  0x69   :  { %312 = vmatmul.f32.gmra.mxu2 %v41_v46  ;;  %271 = vmatmul.f32.gmra.mxu1 %v40_v47 }
  0x6b   :  { %359 = vmatmul.f32.gmra.mxu3 %v52_v52 }
  0x6d   :  { %430 = vmatmul.msk.f32.gmra.mxu0 %vm174_vm0, %v48_v53 }
  0x71   :  { %315 = vmatmul.f32.gmra.mxu2 %v46_v50  ;;  %274 = vmatmul.f32.gmra.mxu1 %v45_v51 }
  0x75   :  { %431 = vmatmul.msk.f32.gmra.mxu0 %vm174_vm0, %v53_v56 }
  0x79   :  { %318 = vmatmul.f32.gmra.mxu2 %v51_v54  ;;  %277 = vmatmul.f32.gmra.mxu1 %v50_v55 }
  0x85   :  { %v147_v18 = vpop.permute.xlu1 %146 }
  0x89   :  { %v137_v2 = vpop.permute.xlu0 %136 }
  0x91   :  { %v152_v31 = vpop.permute.xlu1 %151  ;;  %v157_v40 = vpop.permute.xlu2 %156 }
  0x97   :  { %v142_v12 = vpop.permute.xlu0 %141 }
  0x99   :  { %v162_v53 = vpop.permute.xlu2 %161 }
  0x9e   :  { %v222_v57 = vpop.f32.mrf.mxu1 }
  0x9f   :  { %v223_v26 = vadd.f32 %v222_v57, %v147_v18 }
  0xa2   :  { %v216_v59 = vpop.f32.mrf.mxu0 }
  0xa3   :  { %v217_v5 = vadd.f32 %v216_v59, %v137_v2 }
  0xa4   :  { %v860_v61 = vpop.f32.mrf.mxu2 }
  0xa6   :  { %v225_v58 = vpop.f32.mrf.mxu1 }
  0xa7   :  { %v226_v36 = vadd.f32 %v225_v58, %v152_v31 }
  0xac   :  { %v864_v0 = vpop.f32.mrf.mxu2 }
  0xae   :  { %v228_v60 = vpop.f32.mrf.mxu1 }
  0xaf   :  { %v229_v47 = vadd.f32 %v228_v60, %v157_v40 }
  0xb0   :  { %v219_v62 = vpop.f32.mrf.mxu0 }
  0xb1   :  { %v220_v14 = vadd.f32 %v219_v62, %v142_v12 }
  0xb6   :  { %v862_v63 = vpop.f32.mrf.mxu1  ;;  %v339_v1 = vpop.f32.mrf.mxu3 }
  0xb7   :  { %v232_v57 = vadd.f32 %v862_v63, %v162_v53 }
  0xba   :  { %v380_v4 = vpop.f32.mrf.mxu0 }
  0xbe   :  { %v257_v3 = vpop.f32.mrf.mxu1  ;;  %v342_v9 = vpop.f32.mrf.mxu3 }
  0xbf   :  { %v258_v6 = vadd.f32 %v257_v3, %v217_v5  ;;  %v167_v3 = vpop.permute.xlu0 %166 }
  0xc2   :  { %v383_v13 = vpop.f32.mrf.mxu0 }
  0xc4   :  { %v298_v7 = vpop.f32.mrf.mxu2 }
  0xc5   :  { %v299_v8 = vadd.f32 %v298_v7, %v258_v6  ;;  %v235_v6 = vadd.f32 %v860_v61, %v167_v3 }
  0xc6   :  { %v260_v11 = vpop.f32.mrf.mxu1  ;;  %v345_v22 = vpop.f32.mrf.mxu3 }
  0xc7   :  { %v340_v10 = vadd.f32 %v339_v1, %v299_v8  ;;  %v261_v16 = vadd.f32 %v260_v11, %v220_v14 }
  0xc9   :  { %v381_v15 = vadd.f32 %v380_v4, %v340_v10 }
  0xca   :  { %v386_v25 = vpop.f32.mrf.mxu0 }
  0xcb   :  { %v404_v17 = vmax.f32 %v381_v15, 0.0 }
  0xcc   :  { %v301_v20 = vpop.f32.mrf.mxu2 }
  0xcd   :  { %412 = vst [vmem:[%s896_s3] sm:$0xff] %v404_v17  ;;  %v302_v21 = vadd.f32 %v301_v20, %v261_v16 }
  0xce   :  { %v263_v24 = vpop.f32.mrf.mxu1  ;;  %v348_v32 = vpop.f32.mrf.mxu3 }
  0xcf   :  { %v343_v23 = vadd.f32 %v342_v9, %v302_v21  ;;  %v264_v28 = vadd.f32 %v263_v24, %v223_v26 }
  0xd1   :  { %v384_v27 = vadd.f32 %v383_v13, %v343_v23  ;;  %v172_v13 = vpop.permute.xlu1 %171 }
  0xd2   :  { %v389_v35 = vpop.f32.mrf.mxu0  ;;  %v238_v16 = vadd.f32 %v864_v0, %v172_v13 }
  0xd3   :  { %v405_v29 = vmax.f32 %v384_v27, 0.0 }
  0xd4   :  { %v304_v19 = vpop.f32.mrf.mxu2 }
  0xd5   :  { %413 = vst [vmem:[%s896_s3 + $0x8] sm:$0xff] %v405_v29  ;;  %v305_v30 = vadd.f32 %v304_v19, %v264_v28 }
  0xd6   :  { %v266_v34 = vpop.f32.mrf.mxu1  ;;  %v351_v43 = vpop.f32.mrf.mxu3 }
  0xd7   :  { %v346_v33 = vadd.f32 %v345_v22, %v305_v30  ;;  %v267_v38 = vadd.f32 %v266_v34, %v226_v36 }
  0xd9   :  { %v387_v37 = vadd.f32 %v386_v25, %v346_v33 }
  0xda   :  { %v392_v46 = vpop.f32.mrf.mxu0 }
  0xdb   :  { %v406_v39 = vmax.f32 %v387_v37, 0.0 }
  0xdc   :  { %v307_v41 = vpop.f32.mrf.mxu2 }
  0xdd   :  { %414 = vst [vmem:[%s896_s3 + $0x10] sm:$0xff] %v406_v39  ;;  %v308_v42 = vadd.f32 %v307_v41, %v267_v38 }
  0xde   :  { %v269_v45 = vpop.f32.mrf.mxu1  ;;  %v354_v56 = vpop.f32.mrf.mxu3 }
  0xdf   :  { %v349_v44 = vadd.f32 %v348_v32, %v308_v42  ;;  %v270_v49 = vadd.f32 %v269_v45, %v229_v47 }
  0xe1   :  { %v390_v48 = vadd.f32 %v389_v35, %v349_v44 }
  0xe2   :  { %v395_v59 = vpop.f32.mrf.mxu0 }
  0xe3   :  { %v407_v50 = vmax.f32 %v390_v48, 0.0 }
  0xe4   :  { %v310_v51 = vpop.f32.mrf.mxu2 }
  0xe5   :  { %415 = vst [vmem:[%s896_s3 + $0x18] sm:$0xff] %v407_v50  ;;  %v311_v52 = vadd.f32 %v310_v51, %v270_v49 }
  0xe6   :  { %v272_v55 = vpop.f32.mrf.mxu1  ;;  %v357_v8 = vpop.f32.mrf.mxu3 }
  0xe7   :  { %v352_v54 = vadd.f32 %v351_v43, %v311_v52  ;;  %v273_v62 = vadd.f32 %v272_v55, %v232_v57 }
  0xe9   :  { %v393_v58 = vadd.f32 %v392_v46, %v352_v54 }
  0xea   :  { %v398_v11 = vpop.f32.mrf.mxu0 }
  0xeb   :  { %v408_v1 = vmax.f32 %v393_v58, 0.0 }
  0xec   :  { %v313_v60 = vpop.f32.mrf.mxu2 }
  0xed   :  { %416 = vst [vmem:[%s896_s3 + $0x20] sm:$0xff] %v408_v1  ;;  %v314_v2 = vadd.f32 %v313_v60, %v273_v62 }
  0xee   :  { %v275_v5 = vpop.f32.mrf.mxu1  ;;  %v360_v21 = vpop.f32.mrf.mxu3 }
  0xef   :  { %v355_v4 = vadd.f32 %v354_v56, %v314_v2  ;;  %v276_v9 = vadd.f32 %v275_v5, %v235_v6 }
  0xf1   :  { %v396_v7 = vadd.f32 %v395_v59, %v355_v4 }
  0xf2   :  { %v401_v23 = vpop.f32.mrf.mxu0 }
  0xf3   :  { %v409_v10 = vmax.f32 %v396_v7, 0.0 }
  0xf4   :  { %v316_v63 = vpop.f32.mrf.mxu2 }
  0xf5   :  { %417 = vst [vmem:[%s896_s3 + $0x28] sm:$0xff] %v409_v10  ;;  %v317_v12 = vadd.f32 %v316_v63, %v276_v9 }
  0xf6   :  { %v278_v15 = vpop.f32.mrf.mxu1 }
  0xf7   :  { %v358_v14 = vadd.f32 %v357_v8, %v317_v12  ;;  %v279_v18 = vadd.f32 %v278_v15, %v238_v16 }
  0xf9   :  { %v399_v17 = vadd.f32 %v398_v11, %v358_v14 }
  0xfb   :  { %v410_v20 = vmax.f32 %v399_v17, 0.0 }
  0xfc   :  { %v319_v61 = vpop.f32.mrf.mxu2 }
  0xfd   :  { %418 = vst [vmem:[%s896_s3 + $0x30] sm:$0xff] %v410_v20  ;;  %v320_v22 = vadd.f32 %v319_v61, %v279_v18 }
  0xff   :  { %v361_v24 = vadd.f32 %v360_v21, %v320_v22 }
 0x101   :  { %v402_v25 = vadd.f32 %v401_v23, %v361_v24 }
 0x103   :  { %v411_v26 = vmax.f32 %v402_v25, 0.0 }
 0x105   :  { %419 = vst [vmem:[%s896_s3 + $0x38] sm:$0xff] %v411_v26 }

// kernel: fe_forward.9
= control target key start
LH: loop header
LB: loop body
LE: loop exit
PB: predicated region body
PF: predicated region fallthrough
CT: control target
= control target key end

     0   :  { %vm93_vm0 = vcmask 523264   ;;  %s247_s1 = inlined_call_operand.vmem [shape: f32[256,64], index: 1, kind: input, shape index: {}]   ;;  %s248_s2 = inlined_call_operand.vmem [shape: f32[1,64], index: 2, kind: input, shape index: {}]   ;;  %s249_s0 = inlined_call_operand.vmem [shape: f32[8,256], index: 0, kind: input, shape index: {}]   ;;  %s250_s3 = inlined_call_operand.vmem [shape: f32[8,64], index: 3, kind: output, shape index: {}]  }
   0x1   :  { %v31_v0 = vld [vmem:[%s247_s1 + $0x78] sm:$0xff]  ;;  %v30_v1 = vld [vmem:[%s247_s1 + $0x70] sm:$0xff]  ;;  %v29_v4 = vld [vmem:[%s247_s1 + $0x68] sm:$0xff] }
   0x2   :  { %v47_v2 = vld [vmem:[%s247_s1 + $0xf8] sm:$0xff]  ;;  %52 = vmatpush.msra.mxu0 %v31_v0  ;;  %v46_v3 = vld [vmem:[%s247_s1 + $0xf0] sm:$0xff]  ;;  %v45_v5 = vld [vmem:[%s247_s1 + $0xe8] sm:$0xff] }
   0x3   :  { %72 = vmatpush.msra.mxu1 %v47_v2  ;;  %v28_v6 = vld [vmem:[%s247_s1 + $0x60] sm:$0xff]  ;;  %v27_v8 = vld [vmem:[%s247_s1 + $0x58] sm:$0xff]  ;;  %v26_v10 = vld [vmem:[%s247_s1 + $0x50] sm:$0xff] }
   0x4   :  { %53 = vmatpush.msra.mxu0 %v30_v1  ;;  %v44_v7 = vld [vmem:[%s247_s1 + $0xe0] sm:$0xff]  ;;  %v43_v9 = vld [vmem:[%s247_s1 + $0xd8] sm:$0xff]  ;;  %v42_v11 = vld [vmem:[%s247_s1 + $0xd0] sm:$0xff] }
   0x5   :  { %73 = vmatpush.msra.mxu1 %v46_v3  ;;  %v25_v12 = vld [vmem:[%s247_s1 + $0x48] sm:$0xff]  ;;  %v24_v14 = vld [vmem:[%s247_s1 + $0x40] sm:$0xff]  ;;  %v23_v16 = vld [vmem:[%s247_s1 + $0x38] sm:$0xff] }
   0x6   :  { %54 = vmatpush.msra.mxu0 %v29_v4  ;;  %v41_v13 = vld [vmem:[%s247_s1 + $0xc8] sm:$0xff]  ;;  %v40_v15 = vld [vmem:[%s247_s1 + $0xc0] sm:$0xff]  ;;  %v39_v17 = vld [vmem:[%s247_s1 + $0xb8] sm:$0xff] }
   0x7   :  { %74 = vmatpush.msra.mxu1 %v45_v5  ;;  %v22_v18 = vld [vmem:[%s247_s1 + $0x30] sm:$0xff]  ;;  %v21_v20 = vld [vmem:[%s247_s1 + $0x28] sm:$0xff]  ;;  %v20_v22 = vld [vmem:[%s247_s1 + $0x20] sm:$0xff] }
   0x8   :  { %55 = vmatpush.msra.mxu0 %v28_v6  ;;  %v38_v19 = vld [vmem:[%s247_s1 + $0xb0] sm:$0xff]  ;;  %v37_v21 = vld [vmem:[%s247_s1 + $0xa8] sm:$0xff]  ;;  %v36_v23 = vld [vmem:[%s247_s1 + $0xa0] sm:$0xff] }
   0x9   :  { %75 = vmatpush.msra.mxu1 %v44_v7  ;;  %v19_v24 = vld [vmem:[%s247_s1 + $0x18] sm:$0xff]  ;;  %v18_v26 = vld [vmem:[%s247_s1 + $0x10] sm:$0xff]  ;;  %v17_v28 = vld [vmem:[%s247_s1 + $0x8] sm:$0xff] }
   0xa   :  { %56 = vmatpush.msra.mxu0 %v27_v8  ;;  %v35_v25 = vld [vmem:[%s247_s1 + $0x98] sm:$0xff]  ;;  %v34_v27 = vld [vmem:[%s247_s1 + $0x90] sm:$0xff]  ;;  %v33_v29 = vld [vmem:[%s247_s1 + $0x88] sm:$0xff] }
   0xb   :  { %76 = vmatpush.msra.mxu1 %v43_v9  ;;  %v16_v30 = vld [vmem:[%s247_s1] sm:$0xff]  ;;  %v15_v33 = vld [vmem:[%s249_s0 + $0x8] sm:$0xff] }
   0xc   :  { %57 = vmatpush.msra.mxu0 %v26_v10  ;;  %v32_v31 = vld [vmem:[%s247_s1 + $0x80] sm:$0xff] }
   0xd   :  { %77 = vmatpush.msra.mxu1 %v42_v11  ;;  %v14_v32 = vld [vmem:[%s249_s0] sm:$0xff] }
   0xe   :  { %58 = vmatpush.msra.mxu0 %v25_v12  ;;  %v114_v34 = vld [vmem:[%s248_s2] ss:$0 sm:$0xff] }
   0xf   :  { %78 = vmatpush.msra.mxu1 %v41_v13 }
  0x10   :  { %59 = vmatpush.msra.mxu0 %v24_v14 }
  0x11   :  { %79 = vmatpush.msra.mxu1 %v40_v15 }
  0x12   :  { %60 = vmatpush.msra.mxu0 %v23_v16 }
  0x13   :  { %80 = vmatpush.msra.mxu1 %v39_v17 }
  0x14   :  { %61 = vmatpush.msra.mxu0 %v22_v18 }
  0x15   :  { %81 = vmatpush.msra.mxu1 %v38_v19 }
  0x16   :  { %62 = vmatpush.msra.mxu0 %v21_v20 }
  0x17   :  { %82 = vmatpush.msra.mxu1 %v37_v21 }
  0x18   :  { %63 = vmatpush.msra.mxu0 %v20_v22 }
  0x19   :  { %83 = vmatpush.msra.mxu1 %v36_v23 }
  0x1a   :  { %64 = vmatpush.msra.mxu0 %v19_v24 }
  0x1b   :  { %84 = vmatpush.msra.mxu1 %v35_v25 }
  0x1c   :  { %65 = vmatpush.msra.mxu0 %v18_v26 }
  0x1d   :  { %85 = vmatpush.msra.mxu1 %v34_v27 }
  0x1e   :  { %66 = vmatpush.msra.mxu0 %v17_v28 }
  0x1f   :  { %86 = vmatpush.msra.mxu1 %v33_v29 }
  0x20   :  { %67 = vmatpush.msra.mxu0 %v16_v30 }
  0x21   :  { %87 = vmatpush.msra.mxu1 %v32_v31  ;;  %68 = vmatmul.f32.vlgmr.msra.gmra.mxu0 %v14_v32 }
  0x22   :  { %88 = vmatmul.f32.vlgmr.msra.gmra.mxu1 %v15_v33 }
  0x9e   :  { %v69_v35 = vpop.f32.mrf.mxu0 }
  0x9f   :  { %v89_v36 = vpop.f32.mrf.mxu1  ;;  %v70_v37 = vadd.f32 %v114_v34, %v69_v35 }
  0xa1   :  { %v90_v38 = vadd.f32 %v89_v36, %v70_v37 }
  0xa3   :  { %v92_v39 = vmul.f32 %v90_v38, %v90_v38 }
  0xa5   :  { %v94_v40 = vsel %vm93_vm0, %v92_v39, 0.0 }
  0xa6   :  { %95 = vadd.xlane.f32.xlu0 %v94_v40 }
 0x119   :  { %v96_v41 = vpop.xlane.xlu0 %95 }
 0x11a   :  { %v97_v42 = vmax.f32 %v96_v41, 1e-24 }
 0x11c   :  { %115 = vrsqrt.f32 %v97_v42  ;;  %vm104_vm2 = vweird.f32 %v97_v42 }
 0x122   :  { %v116_v43 = vpop.eup %115 }
 0x123   :  { %v99_v44 = vmul.f32 %v116_v43, %v97_v42  ;;  %vm105_vm1 = vweird.f32 %v116_v43 }
 0x124   :  { %vm106_vm3 = vmor %vm104_vm2, %vm105_vm1 }
 0x125   :  { %v100_v45 = vmul.f32 %v116_v43, %v99_v44 }
 0x127   :  { %v101_v46 = vmul.f32 0.5, %v100_v45 }
 0x129   :  { %v102_v47 = vsub.f32 1.5, %v101_v46 }
 0x12b   :  { %v103_v48 = vmul.f32 %v116_v43, %v102_v47 }
 0x12d   :  { %v107_v49 = vsel %vm106_vm3, %v116_v43, %v103_v48 }
 0x12e   :  { %v108_v50 = vmul.f32 %v107_v49, %v90_v38 }
 0x130   :  { %109 = vst.msk [vmem:[%s250_s3] sm:$0xff] %vm93_vm0, %v108_v50 }

</bundles_post_ra>
